<compile_context>
chip_gen: v5e
topology: v5e:2x2
jax: 0.10.0
libtpu: 0.0.40
codegen_flags: <defaults>
</compile_context>

<pallas_src>
import functools

import jax
import jax.numpy as jnp
from jax.experimental import pallas as pl
from jax.experimental.pallas import tpu as pltpu


def _round_up(a, b):
    return ((a + b - 1) // b) * b


def _highway_kernel(x_ref, w_ref, b_ref, o_ref, *, n_chunks):
    """One (tm, Dp) row tile: fused 2-gate GEMM + tanh/sigmoid + highway combine.

    The tile is processed in `n_chunks` row sub-chunks (statically unrolled) so
    the MXU work of chunk j+1 overlaps the EUP (tanh/sigmoid) work of chunk j.
    """
    dp = w_ref.shape[0]                  # padded feature dim
    rows = x_ref.shape[0]
    chunk = rows // n_chunks             # guaranteed exact & multiple of 8
    mxu_f32 = w_ref.dtype == jnp.float32

    w = w_ref[...]                       # (Dp, 2Dp), resident across the grid
    b = b_ref[...]                       # (1, 2Dp), f32

    for j in range(n_chunks):            # static unroll (<= 4 chunks)
        sl = pl.ds(j * chunk, chunk)
        x = x_ref[sl, :]                 # (chunk, Dp)

        if mxu_f32:
            # f32 validation path: full-precision MXU passes.
            acc = jnp.dot(x, w, preferred_element_type=jnp.float32,
                          precision=jax.lax.Precision.HIGHEST)
        else:
            # bf16 MXU inputs, f32 accumulate.
            acc = jnp.dot(x.astype(w.dtype), w,
                          preferred_element_type=jnp.float32)
        acc = acc + b                    # (chunk, 2Dp) f32

        h = jnp.tanh(acc[:, :dp])        # transform path (EUP)
        t = jax.nn.sigmoid(acc[:, dp:])  # carry gate     (EUP)

        # h*t + x*(1-t) == x + t*(h - x)  (one fewer VPU multiply per element)
        o_ref[sl, :] = (x + t * (h - x)).astype(o_ref.dtype)


@functools.lru_cache(maxsize=1)
def _vmem_limit_bytes():
    """Generation-aware scoped-VMEM limit: ~3/4 of physical VMEM per core."""
    try:
        cap = pltpu.get_tpu_info().vmem_capacity_bytes
        return int(min(cap * 3 // 4, 112 * 1024 * 1024))
    except Exception:
        return 48 * 1024 * 1024          # conservative fallback, safe on v7x


def fuse_highway_params(w_h, b_h, w_t, b_t, *, use_bf16=True):
    """One-time parameter prep (call once; do NOT redo per forward step).

    w_h, w_t: (D, D) stored (in, out) so the kernel computes x @ W (transpose
              of torch's nn.Linear (out, in) layout).  b_h, b_t: (D,).
    Returns (w_fused, b_fused): features zero-padded to a multiple of 128
    lanes and the two gates concatenated -> w_fused (Dp, 2Dp), b_fused
    (1, 2Dp) f32.  Zero pad rows/cols leave the real outputs untouched.
    """
    d = w_h.shape[0]
    dp = _round_up(d, 128)
    pw = ((0, dp - d), (0, dp - d))
    pb = ((0, dp - d),)
    w_fused = jnp.concatenate([jnp.pad(w_h, pw), jnp.pad(w_t, pw)], axis=1)
    if use_bf16:
        w_fused = w_fused.astype(jnp.bfloat16)   # halves resident weight bytes
    b_fused = jnp.concatenate([jnp.pad(b_h, pb), jnp.pad(b_t, pb)])
    b_fused = b_fused.reshape(1, 2 * dp).astype(jnp.float32)
    return w_fused, b_fused


def highway_forward(x, w_fused, b_fused, *, tm=512):
    """Highway forward: x (..., D) -> (..., D); params from fuse_highway_params."""
    orig_shape = x.shape
    d = orig_shape[-1]
    dp = w_fused.shape[0]
    assert w_fused.shape[1] == 2 * dp and b_fused.shape == (1, 2 * dp)
    assert d <= dp

    x2 = x.reshape(-1, d)
    n = x2.shape[0]
    if dp != d:
        x2 = jnp.pad(x2, ((0, 0), (0, dp - d)))   # lane-pad features with zeros

    # Row tile: as large as requested but never bigger than the 8-aligned row
    # count.  Tail rows use Pallas's partial last block (pl.cdiv grid), so no
    # tail-padding blowup.
    tm_eff = min(tm, _round_up(n, 8))
    grid = (pl.cdiv(n, tm_eff),)

    # MXU/EUP overlap: split each row tile into 128-row sub-chunks when aligned.
    n_chunks = 1
    for c in (4, 2):
        if tm_eff >= 128 * c and tm_eff % (8 * c) == 0:
            n_chunks = c
            break

    kernel = functools.partial(_highway_kernel, n_chunks=n_chunks)

    def call(single_buffer_params):
        if single_buffer_params:
            # Grid-invariant weight/bias: single-buffer them (double-buffering a
            # constant block burns VMEM and never overlaps anything).
            w_spec = pl.BlockSpec((dp, 2 * dp), lambda i: (0, 0),
                                  pipeline_mode=pl.Buffered(buffer_count=1))
            b_spec = pl.BlockSpec((1, 2 * dp), lambda i: (0, 0),
                                  pipeline_mode=pl.Buffered(buffer_count=1))
        else:
            w_spec = pl.BlockSpec((dp, 2 * dp), lambda i: (0, 0))
            b_spec = pl.BlockSpec((1, 2 * dp), lambda i: (0, 0))

        return pl.pallas_call(
            kernel,
            out_shape=jax.ShapeDtypeStruct((n, dp), x2.dtype),
            grid_spec=pltpu.PrefetchScalarGridSpec(
                num_scalar_prefetch=0,
                grid=grid,
                in_specs=[
                    pl.BlockSpec((tm_eff, dp), lambda i: (i, 0)),   # x row tile
                    w_spec,                                          # fused weight
                    b_spec,                                          # fused bias
                ],
                out_specs=pl.BlockSpec((tm_eff, dp), lambda i: (i, 0)),
            ),
            compiler_params=pltpu.CompilerParams(
                # "parallel" lets the row axis shard across TensorCores on
                # multi-TC chips (v7x); single-TC v5e/v6e are unaffected.
                dimension_semantics=("parallel",),
                vmem_limit_bytes=_vmem_limit_bytes(),
            ),
        )(x2, w_fused, b_fused)

    try:
        out = call(True)
    except Exception:
        # Pallas build without single-buffer support on pallas_call inputs:
        # fall back to default double buffering (identical semantics).
        out = call(False)

    if dp != d:
        out = out[:, :d]
    return out.reshape(orig_shape)


def highway_ref(x, w_h, b_h, w_t, b_t):
    hp = jax.lax.Precision.HIGHEST
    h = jnp.tanh(jnp.dot(x, w_h, precision=hp) + b_h)
    t = jax.nn.sigmoid(jnp.dot(x, w_t, precision=hp) + b_t)
    return h * t + x * (1.0 - t)


if __name__ == "__main__":
    # Small shapes consistent with the module: batch=2, seq=8, embedding_dim=32.
    batch, seq, d = 2, 8, 32
    key = jax.random.PRNGKey(0)
    kx, kwh, kbh, kwt, kbt = jax.random.split(key, 5)

    x = jax.random.normal(kx, (batch, seq, d), dtype=jnp.float32)

    # Deterministic init mimicking nn.Linear: U(-1/sqrt(D), 1/sqrt(D)).
    bound = 1.0 / jnp.sqrt(jnp.float32(d))
    # Stored pre-transposed (in, out) so the kernel computes x @ W.
    w_h = jax.random.uniform(kwh, (d, d), jnp.float32, -bound, bound)
    b_h = jax.random.uniform(kbh, (d,), jnp.float32, -bound, bound)
    w_t = jax.random.uniform(kwt, (d, d), jnp.float32, -bound, bound)
    b_t = jax.random.uniform(kbt, (d,), jnp.float32, -bound, bound)

    ref = highway_ref(x, w_h, b_h, w_t, b_t)

    # f32 MXU path (precision=HIGHEST): tight check against the JAX reference.
    w_f32, b_f32 = fuse_highway_params(w_h, b_h, w_t, b_t, use_bf16=False)
    out_f32 = jax.block_until_ready(highway_forward(x, w_f32, b_f32))
    assert out_f32.shape == (batch, seq, d)
    assert jnp.allclose(out_f32, ref, atol=1e-5, rtol=1e-5), "f32 path mismatch"

    # bf16-GEMM path (default, fast): tolerance loosened only for bf16 rounding
    # of the matmul inputs; accumulation and elementwise math stay f32.
    w_bf16, b_bf16 = fuse_highway_params(w_h, b_h, w_t, b_t, use_bf16=True)
    out_bf16 = jax.block_until_ready(highway_forward(x, w_bf16, b_bf16))
    assert out_bf16.shape == (batch, seq, d)
    assert jnp.allclose(out_bf16, ref, atol=2e-2, rtol=2e-2), "bf16 path mismatch"

    print("KERNEL_OK")
</pallas_src>

<mosaic_0001>
module attributes {stable_mosaic.version = 11 : i64} {
  func.func @_highway_kernel(%arg0: i32, %arg1: memref<16x128xf32, #tpu.memory_space<vmem>>, %arg2: memref<128x256xf32, #tpu.memory_space<vmem>>, %arg3: memref<1x256xf32, #tpu.memory_space<vmem>>, %arg4: memref<16x128xf32, #tpu.memory_space<vmem>>) attributes {dimension_semantics = [#tpu.dimension_semantics<parallel>], iteration_bounds = array<i64: 1>, scalar_prefetch = 0 : i64, scratch_operands = 0 : i64, tpu.core_type = #tpu.core_type<tc>, window_params = [{transform_indices = @transform_0, window_bounds = array<i64: 16, 128>}, {pipeline_mode = #tpu.pipeline_mode<synchronous>, transform_indices = @transform_1, window_bounds = array<i64: 128, 256>}, {pipeline_mode = #tpu.pipeline_mode<synchronous>, transform_indices = @transform_2, window_bounds = array<i64: 1, 256>}, {transform_indices = @transform_3, window_bounds = array<i64: 16, 128>}]} {
    %c0 = arith.constant 0 : index
    %c0_0 = arith.constant 0 : index
    %0 = vector.load %arg2[%c0, %c0_0] : memref<128x256xf32, #tpu.memory_space<vmem>>, vector<128x256xf32>
    %c0_1 = arith.constant 0 : index
    %c0_2 = arith.constant 0 : index
    %1 = vector.load %arg3[%c0_1, %c0_2] : memref<1x256xf32, #tpu.memory_space<vmem>>, vector<1x256xf32>
    %c0_3 = arith.constant 0 : index
    %c0_4 = arith.constant 0 : index
    %2 = vector.load %arg1[%c0_3, %c0_4] : memref<16x128xf32, #tpu.memory_space<vmem>>, vector<16x128xf32>
    %cst = arith.constant dense<0.000000e+00> : vector<16x256xf32>
    %3 = tpu.matmul %2, %0, %cst {dimension_numbers = #tpu.dot_dimension_numbers<[1], [0], [0], [1], [0, 0, 1, 1], [], []>, precision = #tpu.contract_precision<fp32>} : vector<16x128xf32>, vector<128x256xf32>, vector<16x256xf32> -> vector<16x256xf32>
    %4 = vector.broadcast %1 : vector<1x256xf32> to vector<16x256xf32>
    %5 = arith.addf %3, %4 : vector<16x256xf32>
    %6 = vector.extract_strided_slice %5 {offsets = [0, 0], sizes = [16, 128], strides = [1, 1]} : vector<16x256xf32> to vector<16x128xf32>
    %7 = math.tanh %6 : vector<16x128xf32>
    %8 = vector.extract_strided_slice %5 {offsets = [0, 128], sizes = [16, 128], strides = [1, 1]} : vector<16x256xf32> to vector<16x128xf32>
    %9 = arith.negf %8 : vector<16x128xf32>
    %10 = math.exp %9 : vector<16x128xf32>
    %cst_5 = arith.constant 1.000000e+00 : f32
    %11 = vector.broadcast %cst_5 : f32 to vector<16x128xf32>
    %12 = arith.addf %11, %10 : vector<16x128xf32>
    %13 = arith.divf %11, %12 : vector<16x128xf32>
    %14 = arith.subf %7, %2 : vector<16x128xf32>
    %15 = arith.mulf %13, %14 : vector<16x128xf32>
    %16 = arith.addf %2, %15 : vector<16x128xf32>
    %c0_6 = arith.constant 0 : index
    %c0_7 = arith.constant 0 : index
    %17 = vector.load %arg4[%c0_6, %c0_7] : memref<16x128xf32, #tpu.memory_space<vmem>>, vector<16x128xf32>
    tpu.vector_store %arg4[%c0_6, %c0_7], %16 {strides = array<i32>} : memref<16x128xf32, #tpu.memory_space<vmem>>, vector<16x128xf32>,
    return
  }
  func.func @transform_0(%arg0: i32) -> (i32, i32) {
    %c0_i32 = arith.constant 0 : i32
    %c0_i32_0 = arith.constant 0 : i32
    return %arg0, %c0_i32 : i32, i32
  }
  func.func @transform_1(%arg0: i32) -> (i32, i32) {
    %c0_i32 = arith.constant 0 : i32
    %c0_i32_0 = arith.constant 0 : i32
    %c0_i32_1 = arith.constant 0 : i32
    return %c0_i32, %c0_i32_0 : i32, i32
  }
  func.func @transform_2(%arg0: i32) -> (i32, i32) {
    %c0_i32 = arith.constant 0 : i32
    %c0_i32_0 = arith.constant 0 : i32
    %c0_i32_1 = arith.constant 0 : i32
    return %c0_i32, %c0_i32_0 : i32, i32
  }
  func.func @transform_3(%arg0: i32) -> (i32, i32) {
    %c0_i32 = arith.constant 0 : i32
    %c0_i32_0 = arith.constant 0 : i32
    return %arg0, %c0_i32 : i32, i32
  }
}

module attributes {stable_mosaic.version = 11 : i64} {
  func.func @_highway_kernel(%arg0: i32, %arg1: memref<16x128xf32, #tpu.memory_space<vmem>>, %arg2: memref<128x256xf32, #tpu.memory_space<vmem>>, %arg3: memref<1x256xf32, #tpu.memory_space<vmem>>, %arg4: memref<16x128xf32, #tpu.memory_space<vmem>>) attributes {dimension_semantics = [#tpu.dimension_semantics<parallel>], iteration_bounds = array<i64: 1>, scalar_prefetch = 0 : i64, scratch_operands = 0 : i64, tpu.core_type = #tpu.core_type<tc>, window_params = [{transform_indices = @transform_0, window_bounds = array<i64: 16, 128>}, {pipeline_mode = #tpu.pipeline_mode<synchronous>, transform_indices = @transform_1, window_bounds = array<i64: 128, 256>}, {pipeline_mode = #tpu.pipeline_mode<synchronous>, transform_indices = @transform_2, window_bounds = array<i64: 1, 256>}, {transform_indices = @transform_3, window_bounds = array<i64: 16, 128>}]} {
    %c0 = arith.constant 0 : index
    %c0_0 = arith.constant 0 : index
    %0 = vector.load %arg2[%c0, %c0_0] : memref<128x256xf32, #tpu.memory_space<vmem>>, vector<128x256xf32>
    %c0_1 = arith.constant 0 : index
    %c0_2 = arith.constant 0 : index
    %1 = vector.load %arg3[%c0_1, %c0_2] : memref<1x256xf32, #tpu.memory_space<vmem>>, vector<1x256xf32>
    %c0_3 = arith.constant 0 : index
    %c0_4 = arith.constant 0 : index
    %2 = vector.load %arg1[%c0_3, %c0_4] : memref<16x128xf32, #tpu.memory_space<vmem>>, vector<16x128xf32>
    %cst = arith.constant dense<0.000000e+00> : vector<16x256xf32>
    %3 = tpu.matmul %2, %0, %cst {dimension_numbers = #tpu.dot_dimension_numbers<[1], [0], [0], [1], [0, 0, 1, 1], [], []>, precision = #tpu.contract_precision<fp32>} : vector<16x128xf32>, vector<128x256xf32>, vector<16x256xf32> -> vector<16x256xf32>
    %4 = vector.broadcast %1 : vector<1x256xf32> to vector<16x256xf32>
    %5 = arith.addf %3, %4 : vector<16x256xf32>
    %6 = vector.extract_strided_slice %5 {offsets = [0, 0], sizes = [16, 128], strides = [1, 1]} : vector<16x256xf32> to vector<16x128xf32>
    %7 = math.tanh %6 : vector<16x128xf32>
    %8 = vector.extract_strided_slice %5 {offsets = [0, 128], sizes = [16, 128], strides = [1, 1]} : vector<16x256xf32> to vector<16x128xf32>
    %9 = arith.negf %8 : vector<16x128xf32>
    %10 = math.exp %9 : vector<16x128xf32>
    %cst_5 = arith.constant 1.000000e+00 : f32
    %11 = vector.broadcast %cst_5 : f32 to vector<16x128xf32>
    %12 = arith.addf %11, %10 : vector<16x128xf32>
    %13 = arith.divf %11, %12 : vector<16x128xf32>
    %14 = arith.subf %7, %2 : vector<16x128xf32>
    %15 = arith.mulf %13, %14 : vector<16x128xf32>
    %16 = arith.addf %2, %15 : vector<16x128xf32>
    %c0_6 = arith.constant 0 : index
    %c0_7 = arith.constant 0 : index
    %17 = vector.load %arg4[%c0_6, %c0_7] : memref<16x128xf32, #tpu.memory_space<vmem>>, vector<16x128xf32>
    tpu.vector_store %arg4[%c0_6, %c0_7], %16 {strides = array<i32>} : memref<16x128xf32, #tpu.memory_space<vmem>>, vector<16x128xf32>,
    return
  }
  func.func @transform_0(%arg0: i32) -> (i32, i32) {
    %c0_i32 = arith.constant 0 : i32
    %c0_i32_0 = arith.constant 0 : i32
    return %arg0, %c0_i32 : i32, i32
  }
  func.func @transform_1(%arg0: i32) -> (i32, i32) {
    %c0_i32 = arith.constant 0 : i32
    %c0_i32_0 = arith.constant 0 : i32
    %c0_i32_1 = arith.constant 0 : i32
    return %c0_i32, %c0_i32_0 : i32, i32
  }
  func.func @transform_2(%arg0: i32) -> (i32, i32) {
    %c0_i32 = arith.constant 0 : i32
    %c0_i32_0 = arith.constant 0 : i32
    %c0_i32_1 = arith.constant 0 : i32
    return %c0_i32, %c0_i32_0 : i32, i32
  }
  func.func @transform_3(%arg0: i32) -> (i32, i32) {
    %c0_i32 = arith.constant 0 : i32
    %c0_i32_0 = arith.constant 0 : i32
    return %arg0, %c0_i32 : i32, i32
  }
}

</mosaic_0001>

<bundles_post_ra>
// kernel: tpu_custom_call.1
= control target key start
LH: loop header
LB: loop body
LE: loop exit
PB: predicated region body
PF: predicated region fallthrough
CT: control target
= control target key end

     0   :  { %8 = vsyncpa [#allocation3], 0  ;;  %s1622_s0 = inlined_call_operand.hbm [shape: f32[16,128], index: 0, kind: input, shape index: {}]   ;;  %s1623_s1 = inlined_call_operand.hbm [shape: f32[128,256], index: 1, kind: input, shape index: {}]   ;;  %s1624_s2 = inlined_call_operand.hbm [shape: f32[1,256], index: 2, kind: input, shape index: {}]   ;;  %s1625_s3 = inlined_call_operand.hbm [shape: f32[16,128], index: 3, kind: output, shape index: {}]  }
   0x1   :  { %9 = vsyncpa [#allocation6], 0  ;;  %s28_s14 = sshll.u32 %s1623_s1, 4  ;;  %s29_s14 = int_to_ptr.hbm [resolvable:$true] %s28_s14 }
   0x2   :  { %10 = vsyncpa [#allocation4], 0  ;;  %s1036_s15 = smov [#allocation5]   ;;  %s15_s19 = sshll.u32 %s1622_s0, 4  ;;  %s16_s19 = int_to_ptr.hbm [resolvable:$true] %s15_s19 }
   0x3   :  { %s30_s16 = sshll.u32 %s1036_s15, 4  ;;  %s1037_s20 = smov 256   ;;  %s31_s16 = int_to_ptr.vmem [resolvable:$true] %s30_s16 }
   0x4   :  { %s1038_s21 = smov 16   ;;  %s1039_s22 = smov [#allocation2]  }
   0x5   :  { %36 = dma.hbm_to_vmem [thread:$0]  %s29_s14, 4096, %s31_s16, [#allocation6], %s1037_s20, %s1037_s20, %s1038_s21  }
   0x6   :  { %s17_s23 = sshll.u32 %s1039_s22, 4  ;;  %s1040_s24 = smov 128   ;;  %s18_s23 = int_to_ptr.vmem [resolvable:$true] %s17_s23 }
   0x7   :  { %s1041_s25 = smov 8   ;;  %s42_s27 = sshll.u32 %s1624_s2, 4  ;;  %s43_s27 = int_to_ptr.hbm [resolvable:$true] %s42_s27 }
   0x8   :  { %23 = dma.hbm_to_vmem [thread:$0]  %s16_s19, 256, %s18_s23, [#allocation3], %s1040_s24, %s1040_s24, %s1041_s25  }
   0x9   :  { %s1042_s28 = smov [#allocation7]  }
   0xa   :  { %s44_s0 = sshll.u32 %s1042_s28, 4  ;;  %s45_s0 = int_to_ptr.vmem [resolvable:$true] %s44_s0 }
   0xb   :  { %47 = dma.hbm_to_vmem [thread:$0]  %s43_s27, 32, %s45_s0, [#allocation6]  }
   0xc   :  { %1030 = dma.done.wait [#allocation3], 256  }
   0xd   :  { %1031 = vsyncadd [#allocation3], 4294967040 }
   0xe   :  { %1032 = dma.done.wait [#allocation6], 4128  }
   0xf   :  { %1033 = vsyncadd [#allocation6], 4294963168  ;;  %v90_v0 = vld [vmem:[#allocation5 + $0xf0] sm:$0xff]  ;;  %v88_v1 = vld [vmem:[#allocation5 + $0xe0] sm:$0xff]  ;;  %s1043_s2 = smov [#allocation8]   ;;  %s898_s5 = sshll.u32 %s1625_s3, 4  ;;  %s899_s5 = int_to_ptr.hbm [resolvable:$true] %s898_s5 }
  0x10   :  { %v86_v2 = vld [vmem:[#allocation5 + $0xd0] sm:$0xff]  ;;  %v1076_v3 = vand.u32 4294901760, %v90_v0  ;;  %v1078_v4 = vand.u32 4294901760, %v88_v1  ;;  %v84_v6 = vld [vmem:[#allocation5 + $0xc0] sm:$0xff]  ;;  %v91_v59 = vld [vmem:[#allocation5 + $0xf8] sm:$0xff]  ;;  %s896_s29 = sshll.u32 %s1043_s2, 4  ;;  %s897_s29 = int_to_ptr.vmem [resolvable:$true] %s896_s29 }
  0x11   :  { %v1080_v5 = vand.u32 4294901760, %v86_v2  ;;  %v82_v7 = vld [vmem:[#allocation5 + $0xb0] sm:$0xff]  ;;  %v80_v8 = vld [vmem:[#allocation5 + $0xa0] sm:$0xff]  ;;  %v1082_v9 = vand.u32 4294901760, %v84_v6 }
  0x12   :  { %v1084_v10 = vand.u32 4294901760, %v82_v7  ;;  %v1086_v11 = vand.u32 4294901760, %v80_v8  ;;  %v78_v12 = vld [vmem:[#allocation5 + $0x90] sm:$0xff]  ;;  %v76_v13 = vld [vmem:[#allocation5 + $0x80] sm:$0xff]  ;;  %101 = vmatpush.msra.mxu0 %v1076_v3  ;;  %v1090_v14 = vsub.f32 %v90_v0, %v1076_v3  ;;  %v1093_v15 = vsub.f32 %v88_v1, %v1078_v4  ;;  %314 = vmatpush.msra.mxu3 %v1076_v3 }
  0x13   :  { %v1097_v16 = vsub.f32 %v86_v2, %v1080_v5  ;;  %v1099_v17 = vand.u32 4294901760, %v78_v12  ;;  %v1102_v18 = vsub.f32 %v84_v6, %v1082_v9  ;;  %v74_v21 = vld [vmem:[#allocation5 + $0x70] sm:$0xff]  ;;  %v1115_v25 = vand.u32 4294901760, %v76_v13  ;;  %v72_v26 = vld [vmem:[#allocation5 + $0x60] sm:$0xff]  ;;  %v89_v2 = vld [vmem:[#allocation5 + $0xe8] sm:$0xff] }
  0x14   :  { %v1105_v19 = vsub.f32 %v82_v7, %v1084_v10  ;;  %v1108_v20 = vsub.f32 %v80_v8, %v1086_v11  ;;  %103 = vmatpush.msra.mxu0 %v1078_v4  ;;  %256 = vmatpush.msra.mxu2 %v1090_v14  ;;  %v151_v22 = vand.u32 4294901760, %v1090_v14  ;;  %v1641_v23 = vand.u32 4294901760, %v1093_v15  ;;  %v70_v36 = vld [vmem:[#allocation5 + $0x50] sm:$0xff]  ;;  %v68_v42 = vld [vmem:[#allocation5 + $0x40] sm:$0xff] }
  0x15   :  { %v1639_v24 = vand.u32 4294901760, %v1097_v16  ;;  %316 = vmatpush.msra.mxu3 %v1078_v4  ;;  %v1638_v27 = vand.u32 4294901760, %v1102_v18  ;;  %v1121_v29 = vsub.f32 %v78_v12, %v1099_v17  ;;  %v1134_v33 = vand.u32 4294901760, %v74_v21  ;;  %v66_v47 = vld [vmem:[#allocation5 + $0x30] sm:$0xff]  ;;  %v64_v54 = vld [vmem:[#allocation5 + $0x20] sm:$0xff] }
  0x16   :  { %v1635_v28 = vand.u32 4294901760, %v1105_v19  ;;  %105 = vmatpush.msra.mxu0 %v1080_v5  ;;  %259 = vmatpush.msra.mxu2 %v1093_v15  ;;  %v152_v30 = vsub.f32 %v1090_v14, %v151_v22  ;;  %v158_v31 = vsub.f32 %v1093_v15, %v1641_v23  ;;  %v1137_v34 = vand.u32 4294901760, %v72_v26  ;;  %v62_v61 = vld [vmem:[#allocation5 + $0x10] sm:$0xff]  ;;  %v60_v7 = vld [vmem:[#allocation5] sm:$0xff]  ;;  %v73_v23 = vld [vmem:[#allocation5 + $0x68] sm:$0xff] }
  0x17   :  { %v164_v32 = vsub.f32 %v1097_v16, %v1639_v24  ;;  %318 = vmatpush.msra.mxu3 %v1080_v5  ;;  %v1633_v35 = vand.u32 4294901760, %v1108_v20  ;;  %v170_v39 = vsub.f32 %v1102_v18, %v1638_v27  ;;  %v1146_v40 = vsub.f32 %v76_v13, %v1115_v25 }
  0x18   :  { %107 = vmatpush.msra.mxu0 %v1082_v9  ;;  %v153_v37 = vand.u32 4294901760, %v152_v30  ;;  %262 = vmatpush.msra.mxu2 %v1097_v16  ;;  %v159_v38 = vand.u32 4294901760, %v158_v31  ;;  %v176_v41 = vsub.f32 %v1105_v19, %v1635_v28  ;;  %v1153_v44 = vand.u32 4294901760, %v70_v36  ;;  %v75_v28 = vld [vmem:[#allocation5 + $0x78] sm:$0xff] }
  0x19   :  { %320 = vmatpush.msra.mxu3 %v1082_v9  ;;  %v165_v43 = vand.u32 4294901760, %v164_v32  ;;  %v1632_v45 = vand.u32 4294901760, %v1121_v29  ;;  %v1157_v46 = vsub.f32 %v74_v21, %v1134_v33  ;;  %v1162_v48 = vsub.f32 %v72_v26, %v1137_v34  ;;  %v87_v32 = vld [vmem:[#allocation5 + $0xd8] sm:$0xff] }
  0x1a   :  { %109 = vmatpush.msra.mxu0 %v1084_v10  ;;  %154 = vmatpush.msra.mxu1 %v153_v37  ;;  %v171_v49 = vand.u32 4294901760, %v170_v39  ;;  %v182_v50 = vsub.f32 %v1108_v20, %v1633_v35  ;;  %v1168_v51 = vand.u32 4294901760, %v68_v42  ;;  %v1631_v52 = vand.u32 4294901760, %v1146_v40 }
  0x1b   :  { %265 = vmatpush.msra.mxu2 %v1102_v18  ;;  %322 = vmatpush.msra.mxu3 %v1084_v10  ;;  %v1173_v53 = vand.u32 4294901760, %v66_v47  ;;  %v177_v55 = vand.u32 4294901760, %v176_v41  ;;  %v188_v56 = vsub.f32 %v1121_v29, %v1632_v45  ;;  %v1630_v57 = vand.u32 4294901760, %v1157_v46 }
  0x1c   :  { %111 = vmatpush.msra.mxu0 %v1086_v11  ;;  %160 = vmatpush.msra.mxu1 %v159_v38  ;;  %v1181_v58 = vsub.f32 %v70_v36, %v1153_v44  ;;  %v1628_v60 = vand.u32 4294901760, %v1162_v48  ;;  %v183_v62 = vand.u32 4294901760, %v182_v50  ;;  %v194_v63 = vsub.f32 %v1146_v40, %v1631_v52 }
  0x1d   :  { %268 = vmatpush.msra.mxu2 %v1105_v19  ;;  %324 = vmatpush.msra.mxu3 %v1086_v11  ;;  %v1190_v0 = vand.u32 4294901760, %v64_v54  ;;  %v1193_v1 = vsub.f32 %v68_v42, %v1168_v51  ;;  %v1198_v6 = vsub.f32 %v66_v47, %v1173_v53  ;;  %v1200_v8 = vand.u32 4294901760, %v91_v59 }
  0x1e   :  { %113 = vmatpush.msra.mxu0 %v1099_v17  ;;  %166 = vmatpush.msra.mxu1 %v165_v43  ;;  %v189_v12 = vand.u32 4294901760, %v188_v56  ;;  %v200_v13 = vsub.f32 %v1157_v46, %v1630_v57  ;;  %v1206_v21 = vand.u32 4294901760, %v62_v61  ;;  %v1627_v26 = vand.u32 4294901760, %v1181_v58  ;;  %v85_v43 = vld [vmem:[#allocation5 + $0xc8] sm:$0xff]  ;;  %v79_v57 = vld [vmem:[#allocation5 + $0x98] sm:$0xff] }
  0x1f   :  { %271 = vmatpush.msra.mxu2 %v1108_v20  ;;  %326 = vmatpush.msra.mxu3 %v1099_v17  ;;  %v206_v30 = vsub.f32 %v1162_v48, %v1628_v60  ;;  %v1214_v31 = vand.u32 4294901760, %v89_v2  ;;  %v195_v36 = vand.u32 4294901760, %v194_v63  ;;  %v1217_v37 = vand.u32 4294901760, %v60_v7 }
  0x20   :  { %115 = vmatpush.msra.mxu0 %v1115_v25  ;;  %172 = vmatpush.msra.mxu1 %v171_v49  ;;  %v1626_v38 = vand.u32 4294901760, %v1193_v1  ;;  %v1221_v39 = vsub.f32 %v64_v54, %v1190_v0  ;;  %v1629_v41 = vand.u32 4294901760, %v1198_v6  ;;  %v1227_v42 = vsub.f32 %v91_v59, %v1200_v8  ;;  %v83_v59 = vld [vmem:[#allocation5 + $0xb8] sm:$0xff] }
  0x21   :  { %274 = vmatpush.msra.mxu2 %v1121_v29  ;;  %328 = vmatpush.msra.mxu3 %v1115_v25  ;;  %1648 = vst [vmem:[#allocation12_spill] sm:$0xff] %v1217_v37  ;;  %v201_v47 = vand.u32 4294901760, %v200_v13  ;;  %v212_v49 = vsub.f32 %v1181_v58, %v1627_v26  ;;  %v1234_v50 = vsub.f32 %v62_v61, %v1206_v21  ;;  %v1236_v54 = vand.u32 4294901760, %v87_v32  ;;  %v81_v13 = vld [vmem:[#allocation5 + $0xa8] sm:$0xff] }
  0x22   :  { %117 = vmatpush.msra.mxu0 %v1134_v33  ;;  %178 = vmatpush.msra.mxu1 %v177_v55  ;;  %v207_v55 = vand.u32 4294901760, %v206_v30  ;;  %v1241_v56 = vsub.f32 %v89_v2, %v1214_v31  ;;  %v1634_v61 = vand.u32 4294901760, %v1221_v39  ;;  %v1249_v63 = vsub.f32 %v60_v7, %v1217_v37 }
  0x23   :  { %277 = vmatpush.msra.mxu2 %v1146_v40  ;;  %330 = vmatpush.msra.mxu3 %v1134_v33  ;;  %v224_v2 = vsub.f32 %v1198_v6, %v1629_v41  ;;  %v1636_v30 = vand.u32 4294901760, %v1227_v42  ;;  %v1637_v7 = vand.u32 4294901760, %v1234_v50  ;;  %v1264_v26 = vand.u32 4294901760, %v83_v59 }
  0x24   :  { %119 = vmatpush.msra.mxu0 %v1137_v34  ;;  %184 = vmatpush.msra.mxu1 %v183_v62  ;;  %v218_v62 = vsub.f32 %v1193_v1, %v1626_v38  ;;  %v1262_v38 = vsub.f32 %v87_v32, %v1236_v54  ;;  %v1640_v60 = vand.u32 4294901760, %v1241_v56  ;;  %v1269_v41 = vand.u32 4294901760, %v81_v13 }
  0x25   :  { %280 = vmatpush.msra.mxu2 %v1157_v46  ;;  %332 = vmatpush.msra.mxu3 %v1137_v34  ;;  %v230_v32 = vsub.f32 %v1221_v39, %v1634_v61  ;;  %v225_v45 = vand.u32 4294901760, %v224_v2  ;;  %v524_v35 = vsub.f32 %v1227_v42, %v1636_v30  ;;  %v1290_v61 = vsub.f32 %v83_v59, %v1264_v26 }
  0x26   :  { %121 = vmatpush.msra.mxu0 %v1153_v44  ;;  %190 = vmatpush.msra.mxu1 %v189_v12  ;;  %v1251_v12 = vand.u32 4294901760, %v85_v43  ;;  %v1292_v2 = vand.u32 4294901760, %v79_v57  ;;  %v1300_v30 = vsub.f32 %v81_v13, %v1269_v41  ;;  %v1312_v13 = vand.u32 4294901760, %v75_v28 }
  0x27   :  { %283 = vmatpush.msra.mxu2 %v1162_v48  ;;  %334 = vmatpush.msra.mxu3 %v1153_v44  ;;  %v1649_v14 = vand.u32 4294901760, %v1093_v15  ;;  %v1651_v15 = vand.u32 4294901760, %v1097_v16  ;;  %v1654_v16 = vand.u32 4294901760, %v1102_v18  ;;  %v1656_v18 = vand.u32 4294901760, %v1105_v19 }
  0x28   :  { %123 = vmatpush.msra.mxu0 %v1168_v51  ;;  %196 = vmatpush.msra.mxu1 %v195_v36  ;;  %v213_v36 = vand.u32 4294901760, %v212_v49  ;;  %v1642_v49 = vand.u32 4294901760, %v1249_v63  ;;  %v1277_v52 = vsub.f32 %v85_v43, %v1251_v12  ;;  %v1643_v43 = vand.u32 4294901760, %v1262_v38 }
  0x29   :  { %286 = vmatpush.msra.mxu2 %v1181_v58  ;;  %336 = vmatpush.msra.mxu3 %v1168_v51  ;;  %v1320_v27 = vsub.f32 %v79_v57, %v1292_v2  ;;  %v1658_v19 = vand.u32 4294901760, %v1108_v20  ;;  %v1660_v20 = vand.u32 4294901760, %v1121_v29  ;;  %v1662_v29 = vand.u32 4294901760, %v1146_v40 }
  0x2a   :  { %125 = vmatpush.msra.mxu0 %v1173_v53  ;;  %202 = vmatpush.msra.mxu1 %v201_v47  ;;  %v219_v47 = vand.u32 4294901760, %v218_v62  ;;  %v236_v62 = vsub.f32 %v1234_v50, %v1637_v7  ;;  %v231_v7 = vand.u32 4294901760, %v230_v32  ;;  %v242_v59 = vsub.f32 %v1249_v63, %v1642_v49 }
  0x2b   :  { %289 = vmatpush.msra.mxu2 %v1193_v1  ;;  %338 = vmatpush.msra.mxu3 %v1173_v53  ;;  %v536_v32 = vsub.f32 %v1262_v38, %v1643_v43  ;;  %v1650_v43 = vand.u32 4294901760, %v1277_v52  ;;  %v1664_v40 = vand.u32 4294901760, %v1157_v46 }
  0x2c   :  { %127 = vmatpush.msra.mxu0 %v1190_v0  ;;  %208 = vmatpush.msra.mxu1 %v207_v55  ;;  %v77_v55 = vld [vmem:[#allocation5 + $0x88] sm:$0xff] }
  0x2d   :  { %292 = vmatpush.msra.mxu2 %v1198_v6  ;;  %340 = vmatpush.msra.mxu3 %v1190_v0  ;;  %v1307_v24 = vand.u32 4294901760, %v77_v55  ;;  %v542_v49 = vsub.f32 %v1277_v52, %v1650_v43  ;;  %v1653_v43 = vand.u32 4294901760, %v1290_v61 }
  0x2e   :  { %129 = vmatpush.msra.mxu0 %v1206_v21  ;;  %214 = vmatpush.msra.mxu1 %v213_v36  ;;  %v530_v36 = vsub.f32 %v1241_v56, %v1640_v60  ;;  %v525_v60 = vand.u32 4294901760, %v524_v35 }
  0x2f   :  { %295 = vmatpush.msra.mxu2 %v1221_v39  ;;  %342 = vmatpush.msra.mxu3 %v1206_v21  ;;  %v1331_v57 = vsub.f32 %v77_v55, %v1307_v24  ;;  %v548_v55 = vsub.f32 %v1290_v61, %v1653_v43 }
  0x30   :  { %131 = vmatpush.msra.mxu0 %v1217_v37  ;;  %220 = vmatpush.msra.mxu1 %v219_v47  ;;  %v237_v47 = vand.u32 4294901760, %v236_v62  ;;  %v243_v62 = vand.u32 4294901760, %v242_v59  ;;  %v537_v59 = vand.u32 4294901760, %v536_v32  ;;  %v543_v32 = vand.u32 4294901760, %v542_v49 }
  0x31   :  { %298 = vmatpush.msra.mxu2 %v1234_v50  ;;  %344 = vmatpush.msra.mxu3 %v1217_v37  ;;  %v1333_v37 = vand.u32 4294901760, %v73_v23  ;;  %v549_v49 = vand.u32 4294901760, %v548_v55 }
  0x32   :  { %361 = vmatpush.msrb.mxu0 %v151_v22  ;;  %226 = vmatpush.msra.mxu1 %v225_v45  ;;  %v531_v22 = vand.u32 4294901760, %v530_v36  ;;  %v71_v45 = vld [vmem:[#allocation5 + $0x58] sm:$0xff]  ;;  %v1338_v36 = vsub.f32 %v75_v28, %v1312_v13  ;;  %v1655_v28 = vand.u32 4294901760, %v1300_v30 }
  0x33   :  { %301 = vmatpush.msra.mxu2 %v1249_v63  ;;  %526 = vmatpush.msrb.mxu3 %v525_v60  ;;  %v1347_v35 = vand.u32 4294901760, %v71_v45  ;;  %v1357_v43 = vsub.f32 %v73_v23, %v1333_v37 }
  0x34   :  { %365 = vmatpush.msrb.mxu0 %v1649_v14  ;;  %232 = vmatpush.msra.mxu1 %v231_v7  ;;  %v1340_v7 = vld [vmem:[#allocation2] sm:$0xff]  ;;  %v554_v60 = vsub.f32 %v1300_v30, %v1655_v28 }
  0x35   :  { %473 = vmatpush.msrb.mxu2 %v1200_v8  ;;  %1652 = vst [vmem:[#allocation13_spill] sm:$0xff] %v1340_v7  ;;  %532 = vmatpush.msrb.mxu3 %v531_v22  ;;  %v1360_v14 = vand.u32 4294901760, %v1340_v7 }
  0x36   :  { %369 = vmatpush.msrb.mxu0 %v1651_v15  ;;  %238 = vmatpush.msra.mxu1 %v237_v47  ;;  %v69_v47 = vld [vmem:[#allocation5 + $0x48] sm:$0xff]  ;;  %v1373_v15 = vsub.f32 %v71_v45, %v1347_v35 }
  0x37   :  { %475 = vmatpush.msrb.mxu2 %v1214_v31  ;;  %538 = vmatpush.msrb.mxu3 %v537_v59  ;;  %v1370_v28 = vand.u32 4294901760, %v69_v47  ;;  %v1659_v59 = vand.u32 4294901760, %v1331_v57  ;;  %v1385_v45 = vsub.f32 %v1340_v7, %v1360_v14  ;;  %v63_v7 = vld [vmem:[#allocation5 + $0x18] sm:$0xff] }
  0x38   :  { %373 = vmatpush.msrb.mxu0 %v1654_v16  ;;  %244 = vmatpush.msra.mxu1 %v243_v62  ;;  %v67_v16 = vld [vmem:[#allocation5 + $0x38] sm:$0xff]  ;;  %v1657_v62 = vand.u32 4294901760, %v1320_v27 }
  0x39   :  { %477 = vmatpush.msrb.mxu2 %v1236_v54  ;;  %544 = vmatpush.msrb.mxu3 %v543_v32  ;;  %v566_v55 = vsub.f32 %v1331_v57, %v1659_v59  ;;  %v1387_v22 = vand.u32 4294901760, %v67_v16  ;;  %v1398_v59 = vsub.f32 %v69_v47, %v1370_v28  ;;  %v1412_v47 = vand.u32 4294901760, %v1385_v45 }
  0x3a   :  { %377 = vmatpush.msrb.mxu0 %v1656_v18  ;;  %432 = vmatpush.msrb.mxu1 %v1076_v3  ;;  %v560_v23 = vsub.f32 %v1320_v27, %v1657_v62  ;;  %v555_v3 = vand.u32 4294901760, %v554_v60  ;;  %v65_v18 = vld [vmem:[#allocation5 + $0x28] sm:$0xff] }
  0x3b   :  { %479 = vmatpush.msrb.mxu2 %v1251_v12  ;;  %550 = vmatpush.msrb.mxu3 %v549_v49  ;;  %v1400_v62 = vand.u32 4294901760, %v65_v18  ;;  %v567_v49 = vand.u32 4294901760, %v566_v55 }
  0x3c   :  { %381 = vmatpush.msrb.mxu0 %v1658_v19  ;;  %434 = vmatpush.msrb.mxu1 %v1078_v4  ;;  %v1661_v4 = vand.u32 4294901760, %v1338_v36  ;;  %v561_v32 = vand.u32 4294901760, %v560_v23  ;;  %v1647_v19 = vand.u32 4294901760, %v1373_v15  ;;  %v1663_v23 = vand.u32 4294901760, %v1357_v43 }
  0x3d   :  { %481 = vmatpush.msrb.mxu2 %v1264_v26  ;;  %556 = vmatpush.msrb.mxu3 %v555_v3  ;;  %v61_v3 = vld [vmem:[#allocation5 + $0x8] sm:$0xff] }
  0x3e   :  { %385 = vmatpush.msrb.mxu0 %v1660_v20  ;;  %436 = vmatpush.msrb.mxu1 %v1080_v5  ;;  %v572_v60 = vsub.f32 %v1338_v36, %v1661_v4  ;;  %v1405_v5 = vld [vmem:[#allocation2 + $0x8] sm:$0xff]  ;;  %v578_v20 = vsub.f32 %v1357_v43, %v1663_v23  ;;  %v1415_v4 = vsub.f32 %v67_v16, %v1387_v22  ;;  %v589_v23 = vand.u32 4294901760, %v1398_v59 }
  0x3f   :  { %483 = vmatpush.msrb.mxu2 %v1269_v41  ;;  %562 = vmatpush.msrb.mxu3 %v561_v32  ;;  %v584_v55 = vsub.f32 %v1373_v15, %v1647_v19  ;;  %v1428_v16 = vsub.f32 %v65_v18, %v1400_v62  ;;  %v1431_v46 = vand.u32 4294901760, %v1405_v5  ;;  %v135_v32 = vsub.f32 %v1385_v45, %v1412_v47 }
  0x40   :  { %389 = vmatpush.msrb.mxu0 %v1662_v29  ;;  %438 = vmatpush.msrb.mxu1 %v1082_v9  ;;  %v573_v9 = vand.u32 4294901760, %v572_v60  ;;  %v1420_v29 = vand.u32 4294901760, %v63_v7  ;;  %v579_v60 = vand.u32 4294901760, %v578_v20  ;;  %v1440_v19 = vand.u32 4294901760, %v61_v3 }
  0x41   :  { %485 = vmatpush.msrb.mxu2 %v1292_v2  ;;  %568 = vmatpush.msrb.mxu3 %v567_v49  ;;  %v1666_v18 = vand.u32 4294901760, %v1181_v58  ;;  %v590_v49 = vsub.f32 %v1398_v59, %v589_v23  ;;  %v601_v20 = vand.u32 4294901760, %v1428_v16  ;;  %v1667_v58 = vand.u32 4294901760, %v1193_v1 }
  0x42   :  { %393 = vmatpush.msrb.mxu0 %v1664_v40  ;;  %440 = vmatpush.msrb.mxu1 %v1084_v10  ;;  %v1665_v10 = vand.u32 4294901760, %v1162_v48  ;;  %v595_v40 = vand.u32 4294901760, %v1415_v4  ;;  %v1446_v48 = vsub.f32 %v63_v7, %v1420_v29 }
  0x43   :  { %487 = vmatpush.msrb.mxu2 %v1307_v24  ;;  %574 = vmatpush.msrb.mxu3 %v573_v9  ;;  %v1467_v9 = vsub.f32 %v61_v3, %v1440_v19  ;;  %v1669_v3 = vand.u32 4294901760, %v1221_v39 }
  0x44   :  { %397 = vmatpush.msrb.mxu0 %v1665_v10  ;;  %442 = vmatpush.msrb.mxu1 %v1086_v11  ;;  %v585_v11 = vand.u32 4294901760, %v584_v55  ;;  %v1455_v10 = vsub.f32 %v1405_v5, %v1431_v46  ;;  %v596_v7 = vsub.f32 %v1415_v4, %v595_v40  ;;  %v1668_v55 = vand.u32 4294901760, %v1198_v6 }
  0x45   :  { %489 = vmatpush.msrb.mxu2 %v1312_v13  ;;  %580 = vmatpush.msrb.mxu3 %v579_v60  ;;  %v607_v1 = vand.u32 4294901760, %v1446_v48  ;;  %v602_v60 = vsub.f32 %v1428_v16, %v601_v20  ;;  %v613_v6 = vand.u32 4294901760, %v1467_v9 }
  0x46   :  { %401 = vmatpush.msrb.mxu0 %v1666_v18  ;;  %444 = vmatpush.msrb.mxu1 %v1099_v17  ;;  %v1461_v17 = vand.u32 4294901760, %v135_v32  ;;  %v1478_v32 = vand.u32 4294901760, %v1455_v10  ;;  %v1670_v18 = vand.u32 4294901760, %v1234_v50 }
  0x47   :  { %491 = vmatpush.msrb.mxu2 %v1333_v37  ;;  %586 = vmatpush.msrb.mxu3 %v585_v11  ;;  %v608_v11 = vsub.f32 %v1446_v48, %v607_v1 }
  0x48   :  { %405 = vmatpush.msrb.mxu0 %v1667_v58  ;;  %446 = vmatpush.msrb.mxu1 %v1115_v25  ;;  %v591_v25 = vand.u32 4294901760, %v590_v49  ;;  %v143_v39 = vsub.f32 %v1455_v10, %v1478_v32  ;;  %v1671_v49 = vand.u32 4294901760, %v1249_v63  ;;  %v1675_v63 = vand.u32 4294901760, %v1262_v38 }
  0x49   :  { %493 = vmatpush.msrb.mxu2 %v1347_v35  ;;  %137 = vmatmul.f32.vlgmr.msra.gmra.mxu0 %v1461_v17  ;;  %v609_v50 = vand.u32 4294901760, %v608_v11 }
  0x4a   :  { %409 = vmatpush.msrb.mxu0 %v1668_v55  ;;  %448 = vmatpush.msrb.mxu1 %v1134_v33  ;;  %v597_v33 = vand.u32 4294901760, %v596_v7  ;;  %v1505_v58 = vand.u32 4294901760, %v143_v39 }
  0x4b   :  { %495 = vmatpush.msrb.mxu2 %v1370_v28  ;;  %592 = vmatpush.msrb.mxu3 %v591_v25 }
  0x4c   :  { %413 = vmatpush.msrb.mxu0 %v1669_v3  ;;  %450 = vmatpush.msrb.mxu1 %v1137_v34  ;;  %v603_v34 = vand.u32 4294901760, %v602_v60 }
  0x4d   :  { %497 = vmatpush.msrb.mxu2 %v1387_v22  ;;  %246 = vmatmul.f32.vlgmr.msra.gmra.mxu1 %v1360_v14 }
  0x4e   :  { %417 = vmatpush.msrb.mxu0 %v1670_v18  ;;  %452 = vmatpush.msrb.mxu1 %v1153_v44  ;;  %v614_v44 = vsub.f32 %v1467_v9, %v613_v6 }
  0x4f   :  { %499 = vmatpush.msrb.mxu2 %v1400_v62  ;;  %598 = vmatpush.msrb.mxu3 %v597_v33 }
  0x50   :  { %421 = vmatpush.msrb.mxu0 %v1671_v49  ;;  %454 = vmatpush.msrb.mxu1 %v1168_v51  ;;  %v615_v51 = vand.u32 4294901760, %v614_v44 }
  0x51   :  { %501 = vmatpush.msrb.mxu2 %v1420_v29  ;;  %604 = vmatpush.msrb.mxu3 %v603_v34 }
  0x52   :  { %628 = vmatpush.msra.mxu0 %v1227_v42  ;;  %456 = vmatpush.msrb.mxu1 %v1173_v53  ;;  %v1672_v53 = vand.u32 4294901760, %v1227_v42  ;;  %v1674_v42 = vld [vmem:[#allocation12_spill] sm:$0xff] }
  0x53   :  { %304 = vmatmul.f32.vlgmr.msra.gmra.mxu2 %v1385_v45  ;;  %610 = vmatpush.msrb.mxu3 %v609_v50 }
  0x54   :  { %631 = vmatpush.msra.mxu0 %v1241_v56  ;;  %458 = vmatpush.msrb.mxu1 %v1190_v0  ;;  %v1673_v0 = vand.u32 4294901760, %v1241_v56 }
  0x55   :  { %503 = vmatpush.msrb.mxu2 %v1440_v19  ;;  %145 = vmatmul.f32.gmra.mxu0 %v1505_v58 }
  0x56   :  { %634 = vmatpush.msra.mxu0 %v1262_v38  ;;  %348 = vmatmul.f32.vlgmr.msra.gmra.mxu3 %v1412_v47  ;;  %v1677_v38 = vand.u32 4294901760, %v1290_v61 }
  0x57   :  { %733 = vmatpush.msra.mxu2 %v1672_v53  ;;  %460 = vmatpush.msrb.mxu1 %v1206_v21  ;;  %v1676_v21 = vand.u32 4294901760, %v1277_v52 }
  0x58   :  { %616 = vmatpush.msrb.mxu3 %v615_v51  ;;  %637 = vmatpush.msra.mxu0 %v1277_v52  ;;  %v1678_v52 = vand.u32 4294901760, %v1300_v30 }
  0x59   :  { %737 = vmatpush.msra.mxu2 %v1673_v0  ;;  %250 = vmatmul.f32.gmra.mxu1 %v1431_v46 }
  0x5a   :  { %804 = vmatpush.msra.mxu3 %v1200_v8  ;;  %640 = vmatpush.msra.mxu0 %v1290_v61 }
  0x5b   :  { %462 = vmatpush.msrb.mxu1 %v1674_v42  ;;  %741 = vmatpush.msra.mxu2 %v1675_v63 }
  0x5c   :  { %806 = vmatpush.msra.mxu3 %v1214_v31  ;;  %643 = vmatpush.msra.mxu0 %v1300_v30 }
  0x5d   :  { %686 = vmatpush.msra.mxu1 %v1200_v8  ;;  %745 = vmatpush.msra.mxu2 %v1676_v21  ;;  %v1679_v8 = vand.u32 4294901760, %v1320_v27 }
  0x5e   :  { %808 = vmatpush.msra.mxu3 %v1236_v54  ;;  %309 = vmatmul.f32.gmra.mxu2 %v1455_v10 }
  0x5f   :  { %688 = vmatpush.msra.mxu1 %v1214_v31  ;;  %646 = vmatpush.msra.mxu0 %v1320_v27  ;;  %v1680_v31 = vand.u32 4294901760, %v1331_v57  ;;  %v1681_v27 = vand.u32 4294901760, %v1338_v36 }
  0x60   :  { %749 = vmatpush.msra.mxu2 %v1677_v38  ;;  %810 = vmatpush.msra.mxu3 %v1251_v12 }
  0x61   :  { %690 = vmatpush.msra.mxu1 %v1236_v54  ;;  %423 = vmatmul.f32.vlgmr.msrb.gmra.mxu0 %v1360_v14 }
  0x62   :  { %354 = vmatmul.f32.gmra.mxu3 %v1478_v32  ;;  %649 = vmatpush.msra.mxu0 %v1331_v57 }
  0x63   :  { %692 = vmatpush.msra.mxu1 %v1251_v12  ;;  %753 = vmatpush.msra.mxu2 %v1678_v52 }
  0x64   :  { %812 = vmatpush.msra.mxu3 %v1264_v26  ;;  %464 = vmatmul.f32.vlgmr.msrb.gmra.mxu1 %v1360_v14 }
  0x65   :  { %652 = vmatpush.msra.mxu0 %v1338_v36  ;;  %694 = vmatpush.msra.mxu1 %v1264_v26  ;;  %v1682_v26 = vand.u32 4294901760, %v1357_v43 }
  0x66   :  { %757 = vmatpush.msra.mxu2 %v1679_v8  ;;  %814 = vmatpush.msra.mxu3 %v1269_v41 }
  0x67   :  { %655 = vmatpush.msra.mxu0 %v1357_v43  ;;  %696 = vmatpush.msra.mxu1 %v1269_v41  ;;  %v1683_v41 = vand.u32 4294901760, %v1373_v15 }
  0x68   :  { %761 = vmatpush.msra.mxu2 %v1680_v31  ;;  %816 = vmatpush.msra.mxu3 %v1292_v2 }
  0x69   :  { %509 = vmatmul.f32.vlgmr.msrb.gmra.mxu2 %v1461_v17  ;;  %658 = vmatpush.msra.mxu0 %v1373_v15  ;;  %v92_v15 = vld [vmem:[#allocation7] sm:$0x3] }
  0x6a   :  { %698 = vmatpush.msra.mxu1 %v1292_v2  ;;  %765 = vmatpush.msra.mxu2 %v1681_v27  ;;  %v97_v43 = vperm.slane %v92_v15, 1 }
  0x6b   :  { %818 = vmatpush.msra.mxu3 %v1307_v24  ;;  %427 = vmatmul.f32.gmra.mxu0 %v1431_v46 }
  0x6c   :  { %618 = vmatmul.f32.vlgmr.msrb.gmra.mxu3 %v1360_v14  ;;  %661 = vmatpush.msra.mxu0 %v1398_v59 }
  0x6d   :  { %700 = vmatpush.msra.mxu1 %v1307_v24  ;;  %769 = vmatpush.msra.mxu2 %v1682_v26 }
  0x6e   :  { %820 = vmatpush.msra.mxu3 %v1312_v13  ;;  %468 = vmatmul.f32.gmra.mxu1 %v1431_v46 }
  0x6f   :  { %664 = vmatpush.msra.mxu0 %v1415_v4  ;;  %702 = vmatpush.msra.mxu1 %v1312_v13 }
  0x70   :  { %773 = vmatpush.msra.mxu2 %v1683_v41  ;;  %822 = vmatpush.msra.mxu3 %v1333_v37 }
  0x71   :  { %667 = vmatpush.msra.mxu0 %v1428_v16  ;;  %704 = vmatpush.msra.mxu1 %v1333_v37 }
  0x72   :  { %777 = vmatpush.msra.mxu2 %v589_v23  ;;  %824 = vmatpush.msra.mxu3 %v1347_v35 }
  0x73   :  { %517 = vmatmul.f32.gmra.mxu2 %v1505_v58  ;;  %670 = vmatpush.msra.mxu0 %v1446_v48 }
  0x74   :  { %706 = vmatpush.msra.mxu1 %v1347_v35  ;;  %781 = vmatpush.msra.mxu2 %v595_v40 }
  0x75   :  { %826 = vmatpush.msra.mxu3 %v1370_v28  ;;  %673 = vmatpush.msra.mxu0 %v1467_v9 }
  0x76   :  { %622 = vmatmul.f32.gmra.mxu3 %v1431_v46  ;;  %708 = vmatpush.msra.mxu1 %v1370_v28 }
  0x77   :  { %785 = vmatpush.msra.mxu2 %v601_v20  ;;  %828 = vmatpush.msra.mxu3 %v1387_v22 }
  0x78   :  { %676 = vmatmul.f32.vlgmr.msra.gmra.mxu0 %v1385_v45  ;;  %710 = vmatpush.msra.mxu1 %v1387_v22 }
  0x79   :  { %789 = vmatpush.msra.mxu2 %v607_v1  ;;  %830 = vmatpush.msra.mxu3 %v1400_v62 }
  0x7a   :  { %712 = vmatpush.msra.mxu1 %v1400_v62 }
  0x7b   :  { %793 = vmatpush.msra.mxu2 %v613_v6  ;;  %832 = vmatpush.msra.mxu3 %v1420_v29 }
  0x7c   :  { %795 = vmatmul.f32.vlgmr.msra.gmra.mxu2 %v1360_v14  ;;  %714 = vmatpush.msra.mxu1 %v1420_v29 }
  0x7d   :  { %834 = vmatpush.msra.mxu3 %v1440_v19 }
  0x7e   :  { %836 = vmatmul.f32.vlgmr.msra.gmra.mxu3 %v1360_v14  ;;  %716 = vmatpush.msra.mxu1 %v1440_v19  ;;  %v96_v19 = vperm.slane %v92_v15, 0 }
  0x7f   :  { %720 = vmatmul.f32.vlgmr.msra.gmra.mxu1 %v1412_v47 }
  0x80   :  { %681 = vmatmul.f32.gmra.mxu0 %v1455_v10 }
  0x84   :  { %799 = vmatmul.f32.gmra.mxu2 %v1431_v46 }
  0x86   :  { %840 = vmatmul.f32.gmra.mxu3 %v1431_v46 }
  0x87   :  { %726 = vmatmul.f32.gmra.mxu1 %v1478_v32 }
  0xc6   :  { %v138_v24 = vpop.f32.mrf.mxu0 }
  0xc7   :  { %v139_v23 = vadd.f32 %v138_v24, %v96_v19 }
  0xca   :  { %v247_v37 = vpop.f32.mrf.mxu1 }
  0xcb   :  { %v248_v10 = vadd.f32 %v247_v37, %v139_v23 }
  0xd2   :  { %v146_v56 = vpop.f32.mrf.mxu0 }
  0xd3   :  { %v147_v60 = vadd.f32 %v146_v56, %v96_v19 }
  0xd6   :  { %v305_v54 = vpop.f32.mrf.mxu2  ;;  %v251_v12 = vpop.f32.mrf.mxu1 }
  0xd7   :  { %v306_v32 = vadd.f32 %v305_v54, %v248_v10  ;;  %v252_v18 = vadd.f32 %v251_v12, %v147_v60 }
  0xd9   :  { %v349_v61 = vpop.f32.mrf.mxu3 }
  0xda   :  { %v350_v11 = vadd.f32 %v349_v61, %v306_v32  ;;  %v1684_v61 = vld [vmem:[#allocation13_spill] sm:$0xff] }
  0xde   :  { %v424_v2 = vpop.f32.mrf.mxu0 }
  0xdf   :  { %v425_v50 = vadd.f32 %v424_v2, %v350_v11 }
  0xe1   :  { %v310_v30 = vpop.f32.mrf.mxu2  ;;  %v465_v35 = vpop.f32.mrf.mxu1 }
  0xe2   :  { %v311_v58 = vadd.f32 %v310_v30, %v252_v18  ;;  %v466_v53 = vadd.f32 %v465_v35, %v425_v50 }
  0xe5   :  { %v355_v13 = vpop.f32.mrf.mxu3 }
  0xe6   :  { %v356_v0 = vadd.f32 %v355_v13, %v311_v58 }
  0xe8   :  { %v428_v36 = vpop.f32.mrf.mxu0 }
  0xe9   :  { %v429_v21 = vadd.f32 %v428_v36, %v356_v0 }
  0xeb   :  { %v469_v22 = vpop.f32.mrf.mxu1 }
  0xec   :  { %v510_v57 = vpop.f32.mrf.mxu2  ;;  %v470_v31 = vadd.f32 %v469_v22, %v429_v21 }
  0xed   :  { %v511_v28 = vadd.f32 %v510_v57, %v97_v43 }
  0xef   :  { %v619_v14 = vpop.f32.mrf.mxu3 }
  0xf0   :  { %v620_v59 = vadd.f32 %v619_v14, %v511_v28 }
  0xf5   :  { %v677_v62 = vpop.f32.mrf.mxu0 }
  0xf6   :  { %v518_v45 = vpop.f32.mrf.mxu2  ;;  %v678_v4 = vadd.f32 %v677_v62, %v620_v59 }
  0xf7   :  { %v519_v16 = vadd.f32 %v518_v45, %v97_v43 }
  0xf9   :  { %v623_v47 = vpop.f32.mrf.mxu3 }
  0xfa   :  { %v624_v17 = vadd.f32 %v623_v47, %v519_v16 }
  0xfc   :  { %v721_v29 = vpop.f32.mrf.mxu1 }
  0xfd   :  { %v722_v46 = vadd.f32 %v721_v29, %v678_v4  ;;  %v682_v48 = vpop.f32.mrf.mxu0 }
  0xfe   :  { %v683_v55 = vadd.f32 %v682_v48, %v624_v17 }
  0xff   :  { %v796_v40 = vpop.f32.mrf.mxu2 }
 0x100   :  { %v797_v20 = vadd.f32 %v796_v40, %v722_v46 }
 0x101   :  { %v837_v7 = vpop.f32.mrf.mxu3 }
 0x102   :  { %v838_v9 = vadd.f32 %v837_v7, %v797_v20 }
 0x104   :  { %v912_v1 = vmul.f32 -1.442695, %v838_v9  ;;  %v727_v25 = vpop.f32.mrf.mxu1 }
 0x105   :  { %v728_v3 = vadd.f32 %v727_v25, %v683_v55 }
 0x106   :  { %922 = vpow2.f32 %v912_v1 }
 0x107   :  { %v800_v33 = vpop.f32.mrf.mxu2 }
 0x108   :  { %v801_v6 = vadd.f32 %v800_v33, %v728_v3 }
 0x109   :  { %v841_v34 = vpop.f32.mrf.mxu3 }
 0x10a   :  { %v842_v39 = vadd.f32 %v841_v34, %v801_v6 }
 0x10c   :  { %v923_v49 = vpop.eup %922  ;;  %v913_v44 = vmul.f32 -1.442695, %v842_v39 }
 0x10d   :  { %v852_v51 = vadd.f32 1.0, %v923_v49 }
 0x10e   :  { %924 = vpow2.f32 %v913_v44 }
 0x10f   :  { %926 = vrcp.f32 %v852_v51  ;;  %v865_v27 = vand.u32 2147483648, %v852_v51  ;;  %v863_v41 = vand.u32 2147483647, %v852_v51  ;;  %vm859_vm1 = vweird.f32 %v852_v51 }
 0x110   :  { %928 = vtanh.f32 %v466_v53 }
 0x111   :  { %v866_v56 = vor.u32 1.1754944e-38, %v865_v27  ;;  %vm864_vm3 = vcmp.eq.f32.partialorder %v863_v41, 8.507059e+37 }
 0x114   :  { %v925_v42 = vpop.eup %924 }
 0x115   :  { %v927_v63 = vpop.eup %926  ;;  %v853_v38 = vadd.f32 1.0, %v925_v42 }
 0x116   :  { %v855_v52 = vmul.f32 %v927_v63, %v852_v51  ;;  %vm860_vm0 = vweird.f32 %v927_v63  ;;  %v929_v24 = vpop.eup %928 }
 0x117   :  { %930 = vrcp.f32 %v853_v38  ;;  %vm861_vm2 = vmor %vm859_vm1, %vm860_vm0  ;;  %v884_v12 = vsub.f32 %v929_v24, %v1684_v61  ;;  %v880_v36 = vand.u32 2147483648, %v853_v38  ;;  %v878_v15 = vand.u32 2147483647, %v853_v38 }
 0x118   :  { %v856_v8 = vsub.f32 1.0, %v855_v52  ;;  %932 = vtanh.f32 %v470_v31  ;;  %vm874_vm5 = vweird.f32 %v853_v38 }
 0x119   :  { %v881_v62 = vor.u32 1.1754944e-38, %v880_v36  ;;  %vm879_vm7 = vcmp.eq.f32.partialorder %v878_v15, 8.507059e+37 }
 0x11a   :  { %v857_v26 = vmul.f32 %v927_v63, %v856_v8 }
 0x11c   :  { %v858_v37 = vadd.f32 %v927_v63, %v857_v26 }
 0x11d   :  { %v931_v54 = vpop.eup %930 }
 0x11e   :  { %v870_v30 = vmul.f32 %v931_v54, %v853_v38  ;;  %v862_v2 = vsel %vm861_vm2, %v927_v63, %v858_v37  ;;  %vm875_vm4 = vweird.f32 %v931_v54  ;;  %v933_v22 = vpop.eup %932 }
 0x11f   :  { %v867_v13 = vsel %vm864_vm3, %v866_v56, %v862_v2  ;;  %vm876_vm6 = vmor %vm874_vm5, %vm875_vm4  ;;  %v885_v45 = vsub.f32 %v933_v22, %v1405_v5 }
 0x120   :  { %v871_v35 = vsub.f32 1.0, %v870_v30  ;;  %v886_v57 = vmul.f32 %v884_v12, %v867_v13 }
 0x122   :  { %v872_v14 = vmul.f32 %v931_v54, %v871_v35  ;;  %v888_v43 = vadd.f32 %v886_v57, %v1684_v61 }
 0x124   :  { %v873_v28 = vadd.f32 %v931_v54, %v872_v14  ;;  %890 = vst [vmem:[#allocation8] sm:$0xff] %v888_v43 }
 0x126   :  { %v877_v19 = vsel %vm876_vm6, %v931_v54, %v873_v28 }
 0x127   :  { %v882_v59 = vsel %vm879_vm7, %v881_v62, %v877_v19 }
 0x128   :  { %v887_v47 = vmul.f32 %v885_v45, %v882_v59 }
 0x12a   :  { %v889_v4 = vadd.f32 %v887_v47, %v1405_v5 }
 0x12c   :  { %891 = vst [vmem:[#allocation8 + $0x8] sm:$0xff] %v889_v4 }
 0x12d   :  { %904 = dma.vmem_to_hbm [thread:$0]  %s897_s29, 256, %s899_s5, [#allocation4], %s1040_s24, %s1040_s24, %s1041_s25  }
 0x12e   :  { %1034 = dma.done.wait [#allocation4], 256  }
 0x12f   :  { %1035 = vsyncadd [#allocation4], 4294967040 }
 0x130   :  { %909 = vsyncpa [#allocation3], 1 }
 0x131   :  { %910 = vsyncpa [#allocation6], 1 }
 0x132   :  { %911 = vsyncpa [#allocation4], 1 }

// kernel: tpu_custom_call.1
= control target key start
LH: loop header
LB: loop body
LE: loop exit
PB: predicated region body
PF: predicated region fallthrough
CT: control target
= control target key end

     0   :  { %8 = vsyncpa [#allocation3], 0  ;;  %s1622_s0 = inlined_call_operand.hbm [shape: f32[16,128], index: 0, kind: input, shape index: {}]   ;;  %s1623_s1 = inlined_call_operand.hbm [shape: f32[128,256], index: 1, kind: input, shape index: {}]   ;;  %s1624_s2 = inlined_call_operand.hbm [shape: f32[1,256], index: 2, kind: input, shape index: {}]   ;;  %s1625_s3 = inlined_call_operand.hbm [shape: f32[16,128], index: 3, kind: output, shape index: {}]  }
   0x1   :  { %9 = vsyncpa [#allocation6], 0  ;;  %s28_s14 = sshll.u32 %s1623_s1, 4  ;;  %s29_s14 = int_to_ptr.hbm [resolvable:$true] %s28_s14 }
   0x2   :  { %10 = vsyncpa [#allocation4], 0  ;;  %s1036_s15 = smov [#allocation5]   ;;  %s15_s19 = sshll.u32 %s1622_s0, 4  ;;  %s16_s19 = int_to_ptr.hbm [resolvable:$true] %s15_s19 }
   0x3   :  { %s30_s16 = sshll.u32 %s1036_s15, 4  ;;  %s1037_s20 = smov 256   ;;  %s31_s16 = int_to_ptr.vmem [resolvable:$true] %s30_s16 }
   0x4   :  { %s1038_s21 = smov 16   ;;  %s1039_s22 = smov [#allocation2]  }
   0x5   :  { %36 = dma.hbm_to_vmem [thread:$0]  %s29_s14, 4096, %s31_s16, [#allocation6], %s1037_s20, %s1037_s20, %s1038_s21  }
   0x6   :  { %s17_s23 = sshll.u32 %s1039_s22, 4  ;;  %s1040_s24 = smov 128   ;;  %s18_s23 = int_to_ptr.vmem [resolvable:$true] %s17_s23 }
   0x7   :  { %s1041_s25 = smov 8   ;;  %s42_s27 = sshll.u32 %s1624_s2, 4  ;;  %s43_s27 = int_to_ptr.hbm [resolvable:$true] %s42_s27 }
   0x8   :  { %23 = dma.hbm_to_vmem [thread:$0]  %s16_s19, 256, %s18_s23, [#allocation3], %s1040_s24, %s1040_s24, %s1041_s25  }
   0x9   :  { %s1042_s28 = smov [#allocation7]  }
   0xa   :  { %s44_s0 = sshll.u32 %s1042_s28, 4  ;;  %s45_s0 = int_to_ptr.vmem [resolvable:$true] %s44_s0 }
   0xb   :  { %47 = dma.hbm_to_vmem [thread:$0]  %s43_s27, 32, %s45_s0, [#allocation6]  }
   0xc   :  { %1030 = dma.done.wait [#allocation3], 256  }
   0xd   :  { %1031 = vsyncadd [#allocation3], 4294967040 }
   0xe   :  { %1032 = dma.done.wait [#allocation6], 4128  }
   0xf   :  { %1033 = vsyncadd [#allocation6], 4294963168  ;;  %v90_v0 = vld [vmem:[#allocation5 + $0xf0] sm:$0xff]  ;;  %v88_v1 = vld [vmem:[#allocation5 + $0xe0] sm:$0xff]  ;;  %s1043_s2 = smov [#allocation8]   ;;  %s898_s5 = sshll.u32 %s1625_s3, 4  ;;  %s899_s5 = int_to_ptr.hbm [resolvable:$true] %s898_s5 }
  0x10   :  { %v86_v2 = vld [vmem:[#allocation5 + $0xd0] sm:$0xff]  ;;  %v1076_v3 = vand.u32 4294901760, %v90_v0  ;;  %v1078_v4 = vand.u32 4294901760, %v88_v1  ;;  %v84_v6 = vld [vmem:[#allocation5 + $0xc0] sm:$0xff]  ;;  %v91_v59 = vld [vmem:[#allocation5 + $0xf8] sm:$0xff]  ;;  %s896_s29 = sshll.u32 %s1043_s2, 4  ;;  %s897_s29 = int_to_ptr.vmem [resolvable:$true] %s896_s29 }
  0x11   :  { %v1080_v5 = vand.u32 4294901760, %v86_v2  ;;  %v82_v7 = vld [vmem:[#allocation5 + $0xb0] sm:$0xff]  ;;  %v80_v8 = vld [vmem:[#allocation5 + $0xa0] sm:$0xff]  ;;  %v1082_v9 = vand.u32 4294901760, %v84_v6 }
  0x12   :  { %v1084_v10 = vand.u32 4294901760, %v82_v7  ;;  %v1086_v11 = vand.u32 4294901760, %v80_v8  ;;  %v78_v12 = vld [vmem:[#allocation5 + $0x90] sm:$0xff]  ;;  %v76_v13 = vld [vmem:[#allocation5 + $0x80] sm:$0xff]  ;;  %101 = vmatpush.msra.mxu0 %v1076_v3  ;;  %v1090_v14 = vsub.f32 %v90_v0, %v1076_v3  ;;  %v1093_v15 = vsub.f32 %v88_v1, %v1078_v4  ;;  %314 = vmatpush.msra.mxu3 %v1076_v3 }
  0x13   :  { %v1097_v16 = vsub.f32 %v86_v2, %v1080_v5  ;;  %v1099_v17 = vand.u32 4294901760, %v78_v12  ;;  %v1102_v18 = vsub.f32 %v84_v6, %v1082_v9  ;;  %v74_v21 = vld [vmem:[#allocation5 + $0x70] sm:$0xff]  ;;  %v1115_v25 = vand.u32 4294901760, %v76_v13  ;;  %v72_v26 = vld [vmem:[#allocation5 + $0x60] sm:$0xff]  ;;  %v89_v2 = vld [vmem:[#allocation5 + $0xe8] sm:$0xff] }
  0x14   :  { %v1105_v19 = vsub.f32 %v82_v7, %v1084_v10  ;;  %v1108_v20 = vsub.f32 %v80_v8, %v1086_v11  ;;  %103 = vmatpush.msra.mxu0 %v1078_v4  ;;  %256 = vmatpush.msra.mxu2 %v1090_v14  ;;  %v151_v22 = vand.u32 4294901760, %v1090_v14  ;;  %v1641_v23 = vand.u32 4294901760, %v1093_v15  ;;  %v70_v36 = vld [vmem:[#allocation5 + $0x50] sm:$0xff]  ;;  %v68_v42 = vld [vmem:[#allocation5 + $0x40] sm:$0xff] }
  0x15   :  { %v1639_v24 = vand.u32 4294901760, %v1097_v16  ;;  %316 = vmatpush.msra.mxu3 %v1078_v4  ;;  %v1638_v27 = vand.u32 4294901760, %v1102_v18  ;;  %v1121_v29 = vsub.f32 %v78_v12, %v1099_v17  ;;  %v1134_v33 = vand.u32 4294901760, %v74_v21  ;;  %v66_v47 = vld [vmem:[#allocation5 + $0x30] sm:$0xff]  ;;  %v64_v54 = vld [vmem:[#allocation5 + $0x20] sm:$0xff] }
  0x16   :  { %v1635_v28 = vand.u32 4294901760, %v1105_v19  ;;  %105 = vmatpush.msra.mxu0 %v1080_v5  ;;  %259 = vmatpush.msra.mxu2 %v1093_v15  ;;  %v152_v30 = vsub.f32 %v1090_v14, %v151_v22  ;;  %v158_v31 = vsub.f32 %v1093_v15, %v1641_v23  ;;  %v1137_v34 = vand.u32 4294901760, %v72_v26  ;;  %v62_v61 = vld [vmem:[#allocation5 + $0x10] sm:$0xff]  ;;  %v60_v7 = vld [vmem:[#allocation5] sm:$0xff]  ;;  %v73_v23 = vld [vmem:[#allocation5 + $0x68] sm:$0xff] }
  0x17   :  { %v164_v32 = vsub.f32 %v1097_v16, %v1639_v24  ;;  %318 = vmatpush.msra.mxu3 %v1080_v5  ;;  %v1633_v35 = vand.u32 4294901760, %v1108_v20  ;;  %v170_v39 = vsub.f32 %v1102_v18, %v1638_v27  ;;  %v1146_v40 = vsub.f32 %v76_v13, %v1115_v25 }
  0x18   :  { %107 = vmatpush.msra.mxu0 %v1082_v9  ;;  %v153_v37 = vand.u32 4294901760, %v152_v30  ;;  %262 = vmatpush.msra.mxu2 %v1097_v16  ;;  %v159_v38 = vand.u32 4294901760, %v158_v31  ;;  %v176_v41 = vsub.f32 %v1105_v19, %v1635_v28  ;;  %v1153_v44 = vand.u32 4294901760, %v70_v36  ;;  %v75_v28 = vld [vmem:[#allocation5 + $0x78] sm:$0xff] }
  0x19   :  { %320 = vmatpush.msra.mxu3 %v1082_v9  ;;  %v165_v43 = vand.u32 4294901760, %v164_v32  ;;  %v1632_v45 = vand.u32 4294901760, %v1121_v29  ;;  %v1157_v46 = vsub.f32 %v74_v21, %v1134_v33  ;;  %v1162_v48 = vsub.f32 %v72_v26, %v1137_v34  ;;  %v87_v32 = vld [vmem:[#allocation5 + $0xd8] sm:$0xff] }
  0x1a   :  { %109 = vmatpush.msra.mxu0 %v1084_v10  ;;  %154 = vmatpush.msra.mxu1 %v153_v37  ;;  %v171_v49 = vand.u32 4294901760, %v170_v39  ;;  %v182_v50 = vsub.f32 %v1108_v20, %v1633_v35  ;;  %v1168_v51 = vand.u32 4294901760, %v68_v42  ;;  %v1631_v52 = vand.u32 4294901760, %v1146_v40 }
  0x1b   :  { %265 = vmatpush.msra.mxu2 %v1102_v18  ;;  %322 = vmatpush.msra.mxu3 %v1084_v10  ;;  %v1173_v53 = vand.u32 4294901760, %v66_v47  ;;  %v177_v55 = vand.u32 4294901760, %v176_v41  ;;  %v188_v56 = vsub.f32 %v1121_v29, %v1632_v45  ;;  %v1630_v57 = vand.u32 4294901760, %v1157_v46 }
  0x1c   :  { %111 = vmatpush.msra.mxu0 %v1086_v11  ;;  %160 = vmatpush.msra.mxu1 %v159_v38  ;;  %v1181_v58 = vsub.f32 %v70_v36, %v1153_v44  ;;  %v1628_v60 = vand.u32 4294901760, %v1162_v48  ;;  %v183_v62 = vand.u32 4294901760, %v182_v50  ;;  %v194_v63 = vsub.f32 %v1146_v40, %v1631_v52 }
  0x1d   :  { %268 = vmatpush.msra.mxu2 %v1105_v19  ;;  %324 = vmatpush.msra.mxu3 %v1086_v11  ;;  %v1190_v0 = vand.u32 4294901760, %v64_v54  ;;  %v1193_v1 = vsub.f32 %v68_v42, %v1168_v51  ;;  %v1198_v6 = vsub.f32 %v66_v47, %v1173_v53  ;;  %v1200_v8 = vand.u32 4294901760, %v91_v59 }
  0x1e   :  { %113 = vmatpush.msra.mxu0 %v1099_v17  ;;  %166 = vmatpush.msra.mxu1 %v165_v43  ;;  %v189_v12 = vand.u32 4294901760, %v188_v56  ;;  %v200_v13 = vsub.f32 %v1157_v46, %v1630_v57  ;;  %v1206_v21 = vand.u32 4294901760, %v62_v61  ;;  %v1627_v26 = vand.u32 4294901760, %v1181_v58  ;;  %v85_v43 = vld [vmem:[#allocation5 + $0xc8] sm:$0xff]  ;;  %v79_v57 = vld [vmem:[#allocation5 + $0x98] sm:$0xff] }
  0x1f   :  { %271 = vmatpush.msra.mxu2 %v1108_v20  ;;  %326 = vmatpush.msra.mxu3 %v1099_v17  ;;  %v206_v30 = vsub.f32 %v1162_v48, %v1628_v60  ;;  %v1214_v31 = vand.u32 4294901760, %v89_v2  ;;  %v195_v36 = vand.u32 4294901760, %v194_v63  ;;  %v1217_v37 = vand.u32 4294901760, %v60_v7 }
  0x20   :  { %115 = vmatpush.msra.mxu0 %v1115_v25  ;;  %172 = vmatpush.msra.mxu1 %v171_v49  ;;  %v1626_v38 = vand.u32 4294901760, %v1193_v1  ;;  %v1221_v39 = vsub.f32 %v64_v54, %v1190_v0  ;;  %v1629_v41 = vand.u32 4294901760, %v1198_v6  ;;  %v1227_v42 = vsub.f32 %v91_v59, %v1200_v8  ;;  %v83_v59 = vld [vmem:[#allocation5 + $0xb8] sm:$0xff] }
  0x21   :  { %274 = vmatpush.msra.mxu2 %v1121_v29  ;;  %328 = vmatpush.msra.mxu3 %v1115_v25  ;;  %1648 = vst [vmem:[#allocation12_spill] sm:$0xff] %v1217_v37  ;;  %v201_v47 = vand.u32 4294901760, %v200_v13  ;;  %v212_v49 = vsub.f32 %v1181_v58, %v1627_v26  ;;  %v1234_v50 = vsub.f32 %v62_v61, %v1206_v21  ;;  %v1236_v54 = vand.u32 4294901760, %v87_v32  ;;  %v81_v13 = vld [vmem:[#allocation5 + $0xa8] sm:$0xff] }
  0x22   :  { %117 = vmatpush.msra.mxu0 %v1134_v33  ;;  %178 = vmatpush.msra.mxu1 %v177_v55  ;;  %v207_v55 = vand.u32 4294901760, %v206_v30  ;;  %v1241_v56 = vsub.f32 %v89_v2, %v1214_v31  ;;  %v1634_v61 = vand.u32 4294901760, %v1221_v39  ;;  %v1249_v63 = vsub.f32 %v60_v7, %v1217_v37 }
  0x23   :  { %277 = vmatpush.msra.mxu2 %v1146_v40  ;;  %330 = vmatpush.msra.mxu3 %v1134_v33  ;;  %v224_v2 = vsub.f32 %v1198_v6, %v1629_v41  ;;  %v1636_v30 = vand.u32 4294901760, %v1227_v42  ;;  %v1637_v7 = vand.u32 4294901760, %v1234_v50  ;;  %v1264_v26 = vand.u32 4294901760, %v83_v59 }
  0x24   :  { %119 = vmatpush.msra.mxu0 %v1137_v34  ;;  %184 = vmatpush.msra.mxu1 %v183_v62  ;;  %v218_v62 = vsub.f32 %v1193_v1, %v1626_v38  ;;  %v1262_v38 = vsub.f32 %v87_v32, %v1236_v54  ;;  %v1640_v60 = vand.u32 4294901760, %v1241_v56  ;;  %v1269_v41 = vand.u32 4294901760, %v81_v13 }
  0x25   :  { %280 = vmatpush.msra.mxu2 %v1157_v46  ;;  %332 = vmatpush.msra.mxu3 %v1137_v34  ;;  %v230_v32 = vsub.f32 %v1221_v39, %v1634_v61  ;;  %v225_v45 = vand.u32 4294901760, %v224_v2  ;;  %v524_v35 = vsub.f32 %v1227_v42, %v1636_v30  ;;  %v1290_v61 = vsub.f32 %v83_v59, %v1264_v26 }
  0x26   :  { %121 = vmatpush.msra.mxu0 %v1153_v44  ;;  %190 = vmatpush.msra.mxu1 %v189_v12  ;;  %v1251_v12 = vand.u32 4294901760, %v85_v43  ;;  %v1292_v2 = vand.u32 4294901760, %v79_v57  ;;  %v1300_v30 = vsub.f32 %v81_v13, %v1269_v41  ;;  %v1312_v13 = vand.u32 4294901760, %v75_v28 }
  0x27   :  { %283 = vmatpush.msra.mxu2 %v1162_v48  ;;  %334 = vmatpush.msra.mxu3 %v1153_v44  ;;  %v1649_v14 = vand.u32 4294901760, %v1093_v15  ;;  %v1651_v15 = vand.u32 4294901760, %v1097_v16  ;;  %v1654_v16 = vand.u32 4294901760, %v1102_v18  ;;  %v1656_v18 = vand.u32 4294901760, %v1105_v19 }
  0x28   :  { %123 = vmatpush.msra.mxu0 %v1168_v51  ;;  %196 = vmatpush.msra.mxu1 %v195_v36  ;;  %v213_v36 = vand.u32 4294901760, %v212_v49  ;;  %v1642_v49 = vand.u32 4294901760, %v1249_v63  ;;  %v1277_v52 = vsub.f32 %v85_v43, %v1251_v12  ;;  %v1643_v43 = vand.u32 4294901760, %v1262_v38 }
  0x29   :  { %286 = vmatpush.msra.mxu2 %v1181_v58  ;;  %336 = vmatpush.msra.mxu3 %v1168_v51  ;;  %v1320_v27 = vsub.f32 %v79_v57, %v1292_v2  ;;  %v1658_v19 = vand.u32 4294901760, %v1108_v20  ;;  %v1660_v20 = vand.u32 4294901760, %v1121_v29  ;;  %v1662_v29 = vand.u32 4294901760, %v1146_v40 }
  0x2a   :  { %125 = vmatpush.msra.mxu0 %v1173_v53  ;;  %202 = vmatpush.msra.mxu1 %v201_v47  ;;  %v219_v47 = vand.u32 4294901760, %v218_v62  ;;  %v236_v62 = vsub.f32 %v1234_v50, %v1637_v7  ;;  %v231_v7 = vand.u32 4294901760, %v230_v32  ;;  %v242_v59 = vsub.f32 %v1249_v63, %v1642_v49 }
  0x2b   :  { %289 = vmatpush.msra.mxu2 %v1193_v1  ;;  %338 = vmatpush.msra.mxu3 %v1173_v53  ;;  %v536_v32 = vsub.f32 %v1262_v38, %v1643_v43  ;;  %v1650_v43 = vand.u32 4294901760, %v1277_v52  ;;  %v1664_v40 = vand.u32 4294901760, %v1157_v46 }
  0x2c   :  { %127 = vmatpush.msra.mxu0 %v1190_v0  ;;  %208 = vmatpush.msra.mxu1 %v207_v55  ;;  %v77_v55 = vld [vmem:[#allocation5 + $0x88] sm:$0xff] }
  0x2d   :  { %292 = vmatpush.msra.mxu2 %v1198_v6  ;;  %340 = vmatpush.msra.mxu3 %v1190_v0  ;;  %v1307_v24 = vand.u32 4294901760, %v77_v55  ;;  %v542_v49 = vsub.f32 %v1277_v52, %v1650_v43  ;;  %v1653_v43 = vand.u32 4294901760, %v1290_v61 }
  0x2e   :  { %129 = vmatpush.msra.mxu0 %v1206_v21  ;;  %214 = vmatpush.msra.mxu1 %v213_v36  ;;  %v530_v36 = vsub.f32 %v1241_v56, %v1640_v60  ;;  %v525_v60 = vand.u32 4294901760, %v524_v35 }
  0x2f   :  { %295 = vmatpush.msra.mxu2 %v1221_v39  ;;  %342 = vmatpush.msra.mxu3 %v1206_v21  ;;  %v1331_v57 = vsub.f32 %v77_v55, %v1307_v24  ;;  %v548_v55 = vsub.f32 %v1290_v61, %v1653_v43 }
  0x30   :  { %131 = vmatpush.msra.mxu0 %v1217_v37  ;;  %220 = vmatpush.msra.mxu1 %v219_v47  ;;  %v237_v47 = vand.u32 4294901760, %v236_v62  ;;  %v243_v62 = vand.u32 4294901760, %v242_v59  ;;  %v537_v59 = vand.u32 4294901760, %v536_v32  ;;  %v543_v32 = vand.u32 4294901760, %v542_v49 }
  0x31   :  { %298 = vmatpush.msra.mxu2 %v1234_v50  ;;  %344 = vmatpush.msra.mxu3 %v1217_v37  ;;  %v1333_v37 = vand.u32 4294901760, %v73_v23  ;;  %v549_v49 = vand.u32 4294901760, %v548_v55 }
  0x32   :  { %361 = vmatpush.msrb.mxu0 %v151_v22  ;;  %226 = vmatpush.msra.mxu1 %v225_v45  ;;  %v531_v22 = vand.u32 4294901760, %v530_v36  ;;  %v71_v45 = vld [vmem:[#allocation5 + $0x58] sm:$0xff]  ;;  %v1338_v36 = vsub.f32 %v75_v28, %v1312_v13  ;;  %v1655_v28 = vand.u32 4294901760, %v1300_v30 }
  0x33   :  { %301 = vmatpush.msra.mxu2 %v1249_v63  ;;  %526 = vmatpush.msrb.mxu3 %v525_v60  ;;  %v1347_v35 = vand.u32 4294901760, %v71_v45  ;;  %v1357_v43 = vsub.f32 %v73_v23, %v1333_v37 }
  0x34   :  { %365 = vmatpush.msrb.mxu0 %v1649_v14  ;;  %232 = vmatpush.msra.mxu1 %v231_v7  ;;  %v1340_v7 = vld [vmem:[#allocation2] sm:$0xff]  ;;  %v554_v60 = vsub.f32 %v1300_v30, %v1655_v28 }
  0x35   :  { %473 = vmatpush.msrb.mxu2 %v1200_v8  ;;  %1652 = vst [vmem:[#allocation13_spill] sm:$0xff] %v1340_v7  ;;  %532 = vmatpush.msrb.mxu3 %v531_v22  ;;  %v1360_v14 = vand.u32 4294901760, %v1340_v7 }
  0x36   :  { %369 = vmatpush.msrb.mxu0 %v1651_v15  ;;  %238 = vmatpush.msra.mxu1 %v237_v47  ;;  %v69_v47 = vld [vmem:[#allocation5 + $0x48] sm:$0xff]  ;;  %v1373_v15 = vsub.f32 %v71_v45, %v1347_v35 }
  0x37   :  { %475 = vmatpush.msrb.mxu2 %v1214_v31  ;;  %538 = vmatpush.msrb.mxu3 %v537_v59  ;;  %v1370_v28 = vand.u32 4294901760, %v69_v47  ;;  %v1659_v59 = vand.u32 4294901760, %v1331_v57  ;;  %v1385_v45 = vsub.f32 %v1340_v7, %v1360_v14  ;;  %v63_v7 = vld [vmem:[#allocation5 + $0x18] sm:$0xff] }
  0x38   :  { %373 = vmatpush.msrb.mxu0 %v1654_v16  ;;  %244 = vmatpush.msra.mxu1 %v243_v62  ;;  %v67_v16 = vld [vmem:[#allocation5 + $0x38] sm:$0xff]  ;;  %v1657_v62 = vand.u32 4294901760, %v1320_v27 }
  0x39   :  { %477 = vmatpush.msrb.mxu2 %v1236_v54  ;;  %544 = vmatpush.msrb.mxu3 %v543_v32  ;;  %v566_v55 = vsub.f32 %v1331_v57, %v1659_v59  ;;  %v1387_v22 = vand.u32 4294901760, %v67_v16  ;;  %v1398_v59 = vsub.f32 %v69_v47, %v1370_v28  ;;  %v1412_v47 = vand.u32 4294901760, %v1385_v45 }
  0x3a   :  { %377 = vmatpush.msrb.mxu0 %v1656_v18  ;;  %432 = vmatpush.msrb.mxu1 %v1076_v3  ;;  %v560_v23 = vsub.f32 %v1320_v27, %v1657_v62  ;;  %v555_v3 = vand.u32 4294901760, %v554_v60  ;;  %v65_v18 = vld [vmem:[#allocation5 + $0x28] sm:$0xff] }
  0x3b   :  { %479 = vmatpush.msrb.mxu2 %v1251_v12  ;;  %550 = vmatpush.msrb.mxu3 %v549_v49  ;;  %v1400_v62 = vand.u32 4294901760, %v65_v18  ;;  %v567_v49 = vand.u32 4294901760, %v566_v55 }
  0x3c   :  { %381 = vmatpush.msrb.mxu0 %v1658_v19  ;;  %434 = vmatpush.msrb.mxu1 %v1078_v4  ;;  %v1661_v4 = vand.u32 4294901760, %v1338_v36  ;;  %v561_v32 = vand.u32 4294901760, %v560_v23  ;;  %v1647_v19 = vand.u32 4294901760, %v1373_v15  ;;  %v1663_v23 = vand.u32 4294901760, %v1357_v43 }
  0x3d   :  { %481 = vmatpush.msrb.mxu2 %v1264_v26  ;;  %556 = vmatpush.msrb.mxu3 %v555_v3  ;;  %v61_v3 = vld [vmem:[#allocation5 + $0x8] sm:$0xff] }
  0x3e   :  { %385 = vmatpush.msrb.mxu0 %v1660_v20  ;;  %436 = vmatpush.msrb.mxu1 %v1080_v5  ;;  %v572_v60 = vsub.f32 %v1338_v36, %v1661_v4  ;;  %v1405_v5 = vld [vmem:[#allocation2 + $0x8] sm:$0xff]  ;;  %v578_v20 = vsub.f32 %v1357_v43, %v1663_v23  ;;  %v1415_v4 = vsub.f32 %v67_v16, %v1387_v22  ;;  %v589_v23 = vand.u32 4294901760, %v1398_v59 }
  0x3f   :  { %483 = vmatpush.msrb.mxu2 %v1269_v41  ;;  %562 = vmatpush.msrb.mxu3 %v561_v32  ;;  %v584_v55 = vsub.f32 %v1373_v15, %v1647_v19  ;;  %v1428_v16 = vsub.f32 %v65_v18, %v1400_v62  ;;  %v1431_v46 = vand.u32 4294901760, %v1405_v5  ;;  %v135_v32 = vsub.f32 %v1385_v45, %v1412_v47 }
  0x40   :  { %389 = vmatpush.msrb.mxu0 %v1662_v29  ;;  %438 = vmatpush.msrb.mxu1 %v1082_v9  ;;  %v573_v9 = vand.u32 4294901760, %v572_v60  ;;  %v1420_v29 = vand.u32 4294901760, %v63_v7  ;;  %v579_v60 = vand.u32 4294901760, %v578_v20  ;;  %v1440_v19 = vand.u32 4294901760, %v61_v3 }
  0x41   :  { %485 = vmatpush.msrb.mxu2 %v1292_v2  ;;  %568 = vmatpush.msrb.mxu3 %v567_v49  ;;  %v1666_v18 = vand.u32 4294901760, %v1181_v58  ;;  %v590_v49 = vsub.f32 %v1398_v59, %v589_v23  ;;  %v601_v20 = vand.u32 4294901760, %v1428_v16  ;;  %v1667_v58 = vand.u32 4294901760, %v1193_v1 }
  0x42   :  { %393 = vmatpush.msrb.mxu0 %v1664_v40  ;;  %440 = vmatpush.msrb.mxu1 %v1084_v10  ;;  %v1665_v10 = vand.u32 4294901760, %v1162_v48  ;;  %v595_v40 = vand.u32 4294901760, %v1415_v4  ;;  %v1446_v48 = vsub.f32 %v63_v7, %v1420_v29 }
  0x43   :  { %487 = vmatpush.msrb.mxu2 %v1307_v24  ;;  %574 = vmatpush.msrb.mxu3 %v573_v9  ;;  %v1467_v9 = vsub.f32 %v61_v3, %v1440_v19  ;;  %v1669_v3 = vand.u32 4294901760, %v1221_v39 }
  0x44   :  { %397 = vmatpush.msrb.mxu0 %v1665_v10  ;;  %442 = vmatpush.msrb.mxu1 %v1086_v11  ;;  %v585_v11 = vand.u32 4294901760, %v584_v55  ;;  %v1455_v10 = vsub.f32 %v1405_v5, %v1431_v46  ;;  %v596_v7 = vsub.f32 %v1415_v4, %v595_v40  ;;  %v1668_v55 = vand.u32 4294901760, %v1198_v6 }
  0x45   :  { %489 = vmatpush.msrb.mxu2 %v1312_v13  ;;  %580 = vmatpush.msrb.mxu3 %v579_v60  ;;  %v607_v1 = vand.u32 4294901760, %v1446_v48  ;;  %v602_v60 = vsub.f32 %v1428_v16, %v601_v20  ;;  %v613_v6 = vand.u32 4294901760, %v1467_v9 }
  0x46   :  { %401 = vmatpush.msrb.mxu0 %v1666_v18  ;;  %444 = vmatpush.msrb.mxu1 %v1099_v17  ;;  %v1461_v17 = vand.u32 4294901760, %v135_v32  ;;  %v1478_v32 = vand.u32 4294901760, %v1455_v10  ;;  %v1670_v18 = vand.u32 4294901760, %v1234_v50 }
  0x47   :  { %491 = vmatpush.msrb.mxu2 %v1333_v37  ;;  %586 = vmatpush.msrb.mxu3 %v585_v11  ;;  %v608_v11 = vsub.f32 %v1446_v48, %v607_v1 }
  0x48   :  { %405 = vmatpush.msrb.mxu0 %v1667_v58  ;;  %446 = vmatpush.msrb.mxu1 %v1115_v25  ;;  %v591_v25 = vand.u32 4294901760, %v590_v49  ;;  %v143_v39 = vsub.f32 %v1455_v10, %v1478_v32  ;;  %v1671_v49 = vand.u32 4294901760, %v1249_v63  ;;  %v1675_v63 = vand.u32 4294901760, %v1262_v38 }
  0x49   :  { %493 = vmatpush.msrb.mxu2 %v1347_v35  ;;  %137 = vmatmul.f32.vlgmr.msra.gmra.mxu0 %v1461_v17  ;;  %v609_v50 = vand.u32 4294901760, %v608_v11 }
  0x4a   :  { %409 = vmatpush.msrb.mxu0 %v1668_v55  ;;  %448 = vmatpush.msrb.mxu1 %v1134_v33  ;;  %v597_v33 = vand.u32 4294901760, %v596_v7  ;;  %v1505_v58 = vand.u32 4294901760, %v143_v39 }
  0x4b   :  { %495 = vmatpush.msrb.mxu2 %v1370_v28  ;;  %592 = vmatpush.msrb.mxu3 %v591_v25 }
  0x4c   :  { %413 = vmatpush.msrb.mxu0 %v1669_v3  ;;  %450 = vmatpush.msrb.mxu1 %v1137_v34  ;;  %v603_v34 = vand.u32 4294901760, %v602_v60 }
  0x4d   :  { %497 = vmatpush.msrb.mxu2 %v1387_v22  ;;  %246 = vmatmul.f32.vlgmr.msra.gmra.mxu1 %v1360_v14 }
  0x4e   :  { %417 = vmatpush.msrb.mxu0 %v1670_v18  ;;  %452 = vmatpush.msrb.mxu1 %v1153_v44  ;;  %v614_v44 = vsub.f32 %v1467_v9, %v613_v6 }
  0x4f   :  { %499 = vmatpush.msrb.mxu2 %v1400_v62  ;;  %598 = vmatpush.msrb.mxu3 %v597_v33 }
  0x50   :  { %421 = vmatpush.msrb.mxu0 %v1671_v49  ;;  %454 = vmatpush.msrb.mxu1 %v1168_v51  ;;  %v615_v51 = vand.u32 4294901760, %v614_v44 }
  0x51   :  { %501 = vmatpush.msrb.mxu2 %v1420_v29  ;;  %604 = vmatpush.msrb.mxu3 %v603_v34 }
  0x52   :  { %628 = vmatpush.msra.mxu0 %v1227_v42  ;;  %456 = vmatpush.msrb.mxu1 %v1173_v53  ;;  %v1672_v53 = vand.u32 4294901760, %v1227_v42  ;;  %v1674_v42 = vld [vmem:[#allocation12_spill] sm:$0xff] }
  0x53   :  { %304 = vmatmul.f32.vlgmr.msra.gmra.mxu2 %v1385_v45  ;;  %610 = vmatpush.msrb.mxu3 %v609_v50 }
  0x54   :  { %631 = vmatpush.msra.mxu0 %v1241_v56  ;;  %458 = vmatpush.msrb.mxu1 %v1190_v0  ;;  %v1673_v0 = vand.u32 4294901760, %v1241_v56 }
  0x55   :  { %503 = vmatpush.msrb.mxu2 %v1440_v19  ;;  %145 = vmatmul.f32.gmra.mxu0 %v1505_v58 }
  0x56   :  { %634 = vmatpush.msra.mxu0 %v1262_v38  ;;  %348 = vmatmul.f32.vlgmr.msra.gmra.mxu3 %v1412_v47  ;;  %v1677_v38 = vand.u32 4294901760, %v1290_v61 }
  0x57   :  { %733 = vmatpush.msra.mxu2 %v1672_v53  ;;  %460 = vmatpush.msrb.mxu1 %v1206_v21  ;;  %v1676_v21 = vand.u32 4294901760, %v1277_v52 }
  0x58   :  { %616 = vmatpush.msrb.mxu3 %v615_v51  ;;  %637 = vmatpush.msra.mxu0 %v1277_v52  ;;  %v1678_v52 = vand.u32 4294901760, %v1300_v30 }
  0x59   :  { %737 = vmatpush.msra.mxu2 %v1673_v0  ;;  %250 = vmatmul.f32.gmra.mxu1 %v1431_v46 }
  0x5a   :  { %804 = vmatpush.msra.mxu3 %v1200_v8  ;;  %640 = vmatpush.msra.mxu0 %v1290_v61 }
  0x5b   :  { %462 = vmatpush.msrb.mxu1 %v1674_v42  ;;  %741 = vmatpush.msra.mxu2 %v1675_v63 }
  0x5c   :  { %806 = vmatpush.msra.mxu3 %v1214_v31  ;;  %643 = vmatpush.msra.mxu0 %v1300_v30 }
  0x5d   :  { %686 = vmatpush.msra.mxu1 %v1200_v8  ;;  %745 = vmatpush.msra.mxu2 %v1676_v21  ;;  %v1679_v8 = vand.u32 4294901760, %v1320_v27 }
  0x5e   :  { %808 = vmatpush.msra.mxu3 %v1236_v54  ;;  %309 = vmatmul.f32.gmra.mxu2 %v1455_v10 }
  0x5f   :  { %688 = vmatpush.msra.mxu1 %v1214_v31  ;;  %646 = vmatpush.msra.mxu0 %v1320_v27  ;;  %v1680_v31 = vand.u32 4294901760, %v1331_v57  ;;  %v1681_v27 = vand.u32 4294901760, %v1338_v36 }
  0x60   :  { %749 = vmatpush.msra.mxu2 %v1677_v38  ;;  %810 = vmatpush.msra.mxu3 %v1251_v12 }
  0x61   :  { %690 = vmatpush.msra.mxu1 %v1236_v54  ;;  %423 = vmatmul.f32.vlgmr.msrb.gmra.mxu0 %v1360_v14 }
  0x62   :  { %354 = vmatmul.f32.gmra.mxu3 %v1478_v32  ;;  %649 = vmatpush.msra.mxu0 %v1331_v57 }
  0x63   :  { %692 = vmatpush.msra.mxu1 %v1251_v12  ;;  %753 = vmatpush.msra.mxu2 %v1678_v52 }
  0x64   :  { %812 = vmatpush.msra.mxu3 %v1264_v26  ;;  %464 = vmatmul.f32.vlgmr.msrb.gmra.mxu1 %v1360_v14 }
  0x65   :  { %652 = vmatpush.msra.mxu0 %v1338_v36  ;;  %694 = vmatpush.msra.mxu1 %v1264_v26  ;;  %v1682_v26 = vand.u32 4294901760, %v1357_v43 }
  0x66   :  { %757 = vmatpush.msra.mxu2 %v1679_v8  ;;  %814 = vmatpush.msra.mxu3 %v1269_v41 }
  0x67   :  { %655 = vmatpush.msra.mxu0 %v1357_v43  ;;  %696 = vmatpush.msra.mxu1 %v1269_v41  ;;  %v1683_v41 = vand.u32 4294901760, %v1373_v15 }
  0x68   :  { %761 = vmatpush.msra.mxu2 %v1680_v31  ;;  %816 = vmatpush.msra.mxu3 %v1292_v2 }
  0x69   :  { %509 = vmatmul.f32.vlgmr.msrb.gmra.mxu2 %v1461_v17  ;;  %658 = vmatpush.msra.mxu0 %v1373_v15  ;;  %v92_v15 = vld [vmem:[#allocation7] sm:$0x3] }
  0x6a   :  { %698 = vmatpush.msra.mxu1 %v1292_v2  ;;  %765 = vmatpush.msra.mxu2 %v1681_v27  ;;  %v97_v43 = vperm.slane %v92_v15, 1 }
  0x6b   :  { %818 = vmatpush.msra.mxu3 %v1307_v24  ;;  %427 = vmatmul.f32.gmra.mxu0 %v1431_v46 }
  0x6c   :  { %618 = vmatmul.f32.vlgmr.msrb.gmra.mxu3 %v1360_v14  ;;  %661 = vmatpush.msra.mxu0 %v1398_v59 }
  0x6d   :  { %700 = vmatpush.msra.mxu1 %v1307_v24  ;;  %769 = vmatpush.msra.mxu2 %v1682_v26 }
  0x6e   :  { %820 = vmatpush.msra.mxu3 %v1312_v13  ;;  %468 = vmatmul.f32.gmra.mxu1 %v1431_v46 }
  0x6f   :  { %664 = vmatpush.msra.mxu0 %v1415_v4  ;;  %702 = vmatpush.msra.mxu1 %v1312_v13 }
  0x70   :  { %773 = vmatpush.msra.mxu2 %v1683_v41  ;;  %822 = vmatpush.msra.mxu3 %v1333_v37 }
  0x71   :  { %667 = vmatpush.msra.mxu0 %v1428_v16  ;;  %704 = vmatpush.msra.mxu1 %v1333_v37 }
  0x72   :  { %777 = vmatpush.msra.mxu2 %v589_v23  ;;  %824 = vmatpush.msra.mxu3 %v1347_v35 }
  0x73   :  { %517 = vmatmul.f32.gmra.mxu2 %v1505_v58  ;;  %670 = vmatpush.msra.mxu0 %v1446_v48 }
  0x74   :  { %706 = vmatpush.msra.mxu1 %v1347_v35  ;;  %781 = vmatpush.msra.mxu2 %v595_v40 }
  0x75   :  { %826 = vmatpush.msra.mxu3 %v1370_v28  ;;  %673 = vmatpush.msra.mxu0 %v1467_v9 }
  0x76   :  { %622 = vmatmul.f32.gmra.mxu3 %v1431_v46  ;;  %708 = vmatpush.msra.mxu1 %v1370_v28 }
  0x77   :  { %785 = vmatpush.msra.mxu2 %v601_v20  ;;  %828 = vmatpush.msra.mxu3 %v1387_v22 }
  0x78   :  { %676 = vmatmul.f32.vlgmr.msra.gmra.mxu0 %v1385_v45  ;;  %710 = vmatpush.msra.mxu1 %v1387_v22 }
  0x79   :  { %789 = vmatpush.msra.mxu2 %v607_v1  ;;  %830 = vmatpush.msra.mxu3 %v1400_v62 }
  0x7a   :  { %712 = vmatpush.msra.mxu1 %v1400_v62 }
  0x7b   :  { %793 = vmatpush.msra.mxu2 %v613_v6  ;;  %832 = vmatpush.msra.mxu3 %v1420_v29 }
  0x7c   :  { %795 = vmatmul.f32.vlgmr.msra.gmra.mxu2 %v1360_v14  ;;  %714 = vmatpush.msra.mxu1 %v1420_v29 }
  0x7d   :  { %834 = vmatpush.msra.mxu3 %v1440_v19 }
  0x7e   :  { %836 = vmatmul.f32.vlgmr.msra.gmra.mxu3 %v1360_v14  ;;  %716 = vmatpush.msra.mxu1 %v1440_v19  ;;  %v96_v19 = vperm.slane %v92_v15, 0 }
  0x7f   :  { %720 = vmatmul.f32.vlgmr.msra.gmra.mxu1 %v1412_v47 }
  0x80   :  { %681 = vmatmul.f32.gmra.mxu0 %v1455_v10 }
  0x84   :  { %799 = vmatmul.f32.gmra.mxu2 %v1431_v46 }
  0x86   :  { %840 = vmatmul.f32.gmra.mxu3 %v1431_v46 }
  0x87   :  { %726 = vmatmul.f32.gmra.mxu1 %v1478_v32 }
  0xc6   :  { %v138_v24 = vpop.f32.mrf.mxu0 }
  0xc7   :  { %v139_v23 = vadd.f32 %v138_v24, %v96_v19 }
  0xca   :  { %v247_v37 = vpop.f32.mrf.mxu1 }
  0xcb   :  { %v248_v10 = vadd.f32 %v247_v37, %v139_v23 }
  0xd2   :  { %v146_v56 = vpop.f32.mrf.mxu0 }
  0xd3   :  { %v147_v60 = vadd.f32 %v146_v56, %v96_v19 }
  0xd6   :  { %v305_v54 = vpop.f32.mrf.mxu2  ;;  %v251_v12 = vpop.f32.mrf.mxu1 }
  0xd7   :  { %v306_v32 = vadd.f32 %v305_v54, %v248_v10  ;;  %v252_v18 = vadd.f32 %v251_v12, %v147_v60 }
  0xd9   :  { %v349_v61 = vpop.f32.mrf.mxu3 }
  0xda   :  { %v350_v11 = vadd.f32 %v349_v61, %v306_v32  ;;  %v1684_v61 = vld [vmem:[#allocation13_spill] sm:$0xff] }
  0xde   :  { %v424_v2 = vpop.f32.mrf.mxu0 }
  0xdf   :  { %v425_v50 = vadd.f32 %v424_v2, %v350_v11 }
  0xe1   :  { %v310_v30 = vpop.f32.mrf.mxu2  ;;  %v465_v35 = vpop.f32.mrf.mxu1 }
  0xe2   :  { %v311_v58 = vadd.f32 %v310_v30, %v252_v18  ;;  %v466_v53 = vadd.f32 %v465_v35, %v425_v50 }
  0xe5   :  { %v355_v13 = vpop.f32.mrf.mxu3 }
  0xe6   :  { %v356_v0 = vadd.f32 %v355_v13, %v311_v58 }
  0xe8   :  { %v428_v36 = vpop.f32.mrf.mxu0 }
  0xe9   :  { %v429_v21 = vadd.f32 %v428_v36, %v356_v0 }
  0xeb   :  { %v469_v22 = vpop.f32.mrf.mxu1 }
  0xec   :  { %v510_v57 = vpop.f32.mrf.mxu2  ;;  %v470_v31 = vadd.f32 %v469_v22, %v429_v21 }
  0xed   :  { %v511_v28 = vadd.f32 %v510_v57, %v97_v43 }
  0xef   :  { %v619_v14 = vpop.f32.mrf.mxu3 }
  0xf0   :  { %v620_v59 = vadd.f32 %v619_v14, %v511_v28 }
  0xf5   :  { %v677_v62 = vpop.f32.mrf.mxu0 }
  0xf6   :  { %v518_v45 = vpop.f32.mrf.mxu2  ;;  %v678_v4 = vadd.f32 %v677_v62, %v620_v59 }
  0xf7   :  { %v519_v16 = vadd.f32 %v518_v45, %v97_v43 }
  0xf9   :  { %v623_v47 = vpop.f32.mrf.mxu3 }
  0xfa   :  { %v624_v17 = vadd.f32 %v623_v47, %v519_v16 }
  0xfc   :  { %v721_v29 = vpop.f32.mrf.mxu1 }
  0xfd   :  { %v722_v46 = vadd.f32 %v721_v29, %v678_v4  ;;  %v682_v48 = vpop.f32.mrf.mxu0 }
  0xfe   :  { %v683_v55 = vadd.f32 %v682_v48, %v624_v17 }
  0xff   :  { %v796_v40 = vpop.f32.mrf.mxu2 }
 0x100   :  { %v797_v20 = vadd.f32 %v796_v40, %v722_v46 }
 0x101   :  { %v837_v7 = vpop.f32.mrf.mxu3 }
 0x102   :  { %v838_v9 = vadd.f32 %v837_v7, %v797_v20 }
 0x104   :  { %v912_v1 = vmul.f32 -1.442695, %v838_v9  ;;  %v727_v25 = vpop.f32.mrf.mxu1 }
 0x105   :  { %v728_v3 = vadd.f32 %v727_v25, %v683_v55 }
 0x106   :  { %922 = vpow2.f32 %v912_v1 }
 0x107   :  { %v800_v33 = vpop.f32.mrf.mxu2 }
 0x108   :  { %v801_v6 = vadd.f32 %v800_v33, %v728_v3 }
 0x109   :  { %v841_v34 = vpop.f32.mrf.mxu3 }
 0x10a   :  { %v842_v39 = vadd.f32 %v841_v34, %v801_v6 }
 0x10c   :  { %v923_v49 = vpop.eup %922  ;;  %v913_v44 = vmul.f32 -1.442695, %v842_v39 }
 0x10d   :  { %v852_v51 = vadd.f32 1.0, %v923_v49 }
 0x10e   :  { %924 = vpow2.f32 %v913_v44 }
 0x10f   :  { %926 = vrcp.f32 %v852_v51  ;;  %v865_v27 = vand.u32 2147483648, %v852_v51  ;;  %v863_v41 = vand.u32 2147483647, %v852_v51  ;;  %vm859_vm1 = vweird.f32 %v852_v51 }
 0x110   :  { %928 = vtanh.f32 %v466_v53 }
 0x111   :  { %v866_v56 = vor.u32 1.1754944e-38, %v865_v27  ;;  %vm864_vm3 = vcmp.eq.f32.partialorder %v863_v41, 8.507059e+37 }
 0x114   :  { %v925_v42 = vpop.eup %924 }
 0x115   :  { %v927_v63 = vpop.eup %926  ;;  %v853_v38 = vadd.f32 1.0, %v925_v42 }
 0x116   :  { %v855_v52 = vmul.f32 %v927_v63, %v852_v51  ;;  %vm860_vm0 = vweird.f32 %v927_v63  ;;  %v929_v24 = vpop.eup %928 }
 0x117   :  { %930 = vrcp.f32 %v853_v38  ;;  %vm861_vm2 = vmor %vm859_vm1, %vm860_vm0  ;;  %v884_v12 = vsub.f32 %v929_v24, %v1684_v61  ;;  %v880_v36 = vand.u32 2147483648, %v853_v38  ;;  %v878_v15 = vand.u32 2147483647, %v853_v38 }
 0x118   :  { %v856_v8 = vsub.f32 1.0, %v855_v52  ;;  %932 = vtanh.f32 %v470_v31  ;;  %vm874_vm5 = vweird.f32 %v853_v38 }
 0x119   :  { %v881_v62 = vor.u32 1.1754944e-38, %v880_v36  ;;  %vm879_vm7 = vcmp.eq.f32.partialorder %v878_v15, 8.507059e+37 }
 0x11a   :  { %v857_v26 = vmul.f32 %v927_v63, %v856_v8 }
 0x11c   :  { %v858_v37 = vadd.f32 %v927_v63, %v857_v26 }
 0x11d   :  { %v931_v54 = vpop.eup %930 }
 0x11e   :  { %v870_v30 = vmul.f32 %v931_v54, %v853_v38  ;;  %v862_v2 = vsel %vm861_vm2, %v927_v63, %v858_v37  ;;  %vm875_vm4 = vweird.f32 %v931_v54  ;;  %v933_v22 = vpop.eup %932 }
 0x11f   :  { %v867_v13 = vsel %vm864_vm3, %v866_v56, %v862_v2  ;;  %vm876_vm6 = vmor %vm874_vm5, %vm875_vm4  ;;  %v885_v45 = vsub.f32 %v933_v22, %v1405_v5 }
 0x120   :  { %v871_v35 = vsub.f32 1.0, %v870_v30  ;;  %v886_v57 = vmul.f32 %v884_v12, %v867_v13 }
 0x122   :  { %v872_v14 = vmul.f32 %v931_v54, %v871_v35  ;;  %v888_v43 = vadd.f32 %v886_v57, %v1684_v61 }
 0x124   :  { %v873_v28 = vadd.f32 %v931_v54, %v872_v14  ;;  %890 = vst [vmem:[#allocation8] sm:$0xff] %v888_v43 }
 0x126   :  { %v877_v19 = vsel %vm876_vm6, %v931_v54, %v873_v28 }
 0x127   :  { %v882_v59 = vsel %vm879_vm7, %v881_v62, %v877_v19 }
 0x128   :  { %v887_v47 = vmul.f32 %v885_v45, %v882_v59 }
 0x12a   :  { %v889_v4 = vadd.f32 %v887_v47, %v1405_v5 }
 0x12c   :  { %891 = vst [vmem:[#allocation8 + $0x8] sm:$0xff] %v889_v4 }
 0x12d   :  { %904 = dma.vmem_to_hbm [thread:$0]  %s897_s29, 256, %s899_s5, [#allocation4], %s1040_s24, %s1040_s24, %s1041_s25  }
 0x12e   :  { %1034 = dma.done.wait [#allocation4], 256  }
 0x12f   :  { %1035 = vsyncadd [#allocation4], 4294967040 }
 0x130   :  { %909 = vsyncpa [#allocation3], 1 }
 0x131   :  { %910 = vsyncpa [#allocation6], 1 }
 0x132   :  { %911 = vsyncpa [#allocation4], 1 }

</bundles_post_ra>
